<compile_context>
chip_gen: v7x
topology: tpu7x:2x2x1
jax: 0.10.0
libtpu: 0.0.40
codegen_flags: <defaults>
</compile_context>

<pallas_src>
import numpy as np
import jax
import jax.numpy as jnp
from jax.experimental import pallas as pl
from jax.experimental.pallas import tpu as pltpu


# ----------------------------------------------------------------------------- helpers
def _layernorm(x, g, b, eps=1e-6):
    mean = jnp.mean(x, axis=-1, keepdims=True)
    var = jnp.mean(jnp.square(x - mean), axis=-1, keepdims=True)
    return (x - mean) * jax.lax.rsqrt(var + eps) * g + b


def positional_encoding_table(n_position, model_dim):
    pe = np.array(
        [[pos / np.power(10000.0, (i // 2 * 2.0) / model_dim) for i in range(model_dim)]
         for pos in range(n_position)],
        dtype=np.float32,
    )
    pe[:, 0::2] = np.sin(pe[:, 0::2])
    pe[:, 1::2] = np.cos(pe[:, 1::2])
    return jnp.asarray(pe)


# --------------------------------------------------------------------- fused stack kernel
def _make_encoder_kernel(n_head, d_k, collect_attn):
    D = n_head * d_k
    scale = 1.0 / float(np.sqrt(d_k))

    def kernel(emb_ref, pe_ref, lng_ref, lnb_ref, mask_ref,
               wqkv_ref, bqkv_ref, wo_ref, bo_ref,
               ln1g_ref, ln1b_ref, w1_ref, b1_ref, w2_ref, b2_ref,
               ln2g_ref, ln2b_ref, *out_refs):
        if collect_attn:
            out_ref, attn_ref = out_refs
        else:
            (out_ref,) = out_refs
        Bt, S, _ = out_ref.shape
        l = pl.program_id(1)

        # ---- layer 0 prelude: embedding + positional encoding + (dropout=identity) + LN
        @pl.when(l == 0)
        def _():
            x0 = emb_ref[...] + pe_ref[...]                    # (Bt,S,D) + (S,D)
            out_ref[...] = _layernorm(x0, lng_ref[...], lnb_ref[...])

        x3 = out_ref[...]                                      # activations resident in VMEM
        x2 = x3.reshape(Bt * S, D)                             # fold batch into matmul M dim
        xb = x2.astype(jnp.bfloat16)

        # ---- fused QKV projection: one (Bt*S, D) x (D, 3D) bf16 matmul
        qkv = jnp.dot(xb, wqkv_ref[0],
                      preferred_element_type=jnp.float32) + bqkv_ref[0]   # (Bt*S, 3D) f32

        # NOTE: float 0/1 mask, same semantics as torch masked_fill(mask == 0, -1e9)
        neg_mask = mask_ref[...] == 0.0                        # hoisted out of head loop

        o_acc = jnp.zeros((Bt * S, D), jnp.float32)
        for h in range(n_head):                                # static unroll over heads
            lo = h * d_k
            qh = qkv[:, lo:lo + d_k].reshape(Bt, S, d_k).astype(jnp.bfloat16)
            kh = qkv[:, D + lo:D + lo + d_k].reshape(Bt, S, d_k).astype(jnp.bfloat16)
            vh = qkv[:, 2 * D + lo:2 * D + lo + d_k].reshape(Bt, S, d_k).astype(jnp.bfloat16)

            s = jnp.einsum('bqd,bkd->bqk', qh, kh,
                           preferred_element_type=jnp.float32) * scale
            s = jnp.where(neg_mask, -1e9, s)
            s = s - jnp.max(s, axis=-1, keepdims=True)
            e = jnp.exp(s)
            p = e * pl.reciprocal(jnp.sum(e, axis=-1, keepdims=True), approx=True)
            if collect_attn:
                attn_ref[0, :, h] = p

            ctx = jnp.einsum('bqk,bkd->bqd', p.astype(jnp.bfloat16), vh,
                             preferred_element_type=jnp.float32)          # (Bt,S,d_k)
            # project this head's context through its row-block of Wo and accumulate
            # (avoids the lane-axis concatenate over heads)
            o_acc = o_acc + jnp.dot(
                ctx.reshape(Bt * S, d_k).astype(jnp.bfloat16),
                wo_ref[0, lo:lo + d_k, :],
                preferred_element_type=jnp.float32)

        o = o_acc + bo_ref[0]
        # dropout: eval-mode identity; residual + post-LayerNorm
        o = _layernorm(o + x2, ln1g_ref[0], ln1b_ref[0])

        # ---- position-wise FFN
        h1 = jnp.maximum(
            jnp.dot(o.astype(jnp.bfloat16), w1_ref[0],
                    preferred_element_type=jnp.float32) + b1_ref[0], 0.0)
        h2 = jnp.dot(h1.astype(jnp.bfloat16), w2_ref[0],
                     preferred_element_type=jnp.float32) + b2_ref[0]
        y = _layernorm(h2 + o, ln2g_ref[0], ln2b_ref[0])
        out_ref[...] = y.reshape(Bt, S, D)

    return kernel


# ------------------------------------------------------------------------- full encoder
def encoder_forward(params, src_seq, src_mask, n_head, return_attns=False):
    """Matches Encoder.forward(src_seq, src_mask, return_attns)."""
    # embedding gather: plain-JAX glue (data-dependent lookup)
    emb = jnp.take(params["embedding"], src_seq, axis=0)        # (B, S, D)
    B, S, D = emb.shape
    L = params["wqkv"].shape[0]
    H = n_head
    d_k = D // H

    # One batch block at these tiny shapes; keep the leading grid axis 'parallel' so
    # larger batches shard across v7x's two TensorCores.
    Bt = B
    nb = B // Bt

    kernel = _make_encoder_kernel(H, d_k, return_attns)

    act_spec = pl.BlockSpec((Bt, S, D), lambda b, l: (b, 0, 0))
    mask_spec = pl.BlockSpec((Bt, S, S), lambda b, l: (b, 0, 0))

    def shared(name):        # arrays broadcast to every grid step
        shp = params[name].shape
        return pl.BlockSpec(shp, lambda b, l, nd=len(shp): (0,) * nd)

    def per_layer(name):     # stacked [L, ...] params, stream layer l's slice
        shp = params[name].shape
        return pl.BlockSpec((1,) + shp[1:],
                            lambda b, l, nd=len(shp): (l,) + (0,) * (nd - 1))

    weight_names = ["wqkv", "bqkv", "wo", "bo", "ln1g", "ln1b",
                    "w1", "b1", "w2", "b2", "ln2g", "ln2b"]
    in_specs = ([act_spec, shared("pe"), shared("ln_g"), shared("ln_b"), mask_spec]
                + [per_layer(n) for n in weight_names])

    if return_attns:
        out_specs = (act_spec,
                     pl.BlockSpec((1, Bt, H, S, S), lambda b, l: (l, b, 0, 0, 0)))
        out_shape = (jax.ShapeDtypeStruct((B, S, D), jnp.float32),
                     jax.ShapeDtypeStruct((L, B, H, S, S), jnp.float32))
    else:
        out_specs = act_spec
        out_shape = jax.ShapeDtypeStruct((B, S, D), jnp.float32)

    result = pl.pallas_call(
        kernel,
        grid=(nb, L),
        in_specs=in_specs,
        out_specs=out_specs,
        out_shape=out_shape,
        compiler_params=pltpu.CompilerParams(
            dimension_semantics=("parallel", "arbitrary")),
    )(emb, params["pe"], params["ln_g"], params["ln_b"], src_mask,
      *[params[n] for n in weight_names])

    if return_attns:
        enc_out, attn = result
        return enc_out, [attn[i] for i in range(L)]
    return (result,)


# --------------------------------------------------------------------------- init / main
def init_params(key, n_vocab, seq_len, model_dim, n_head, hidden_size, n_layers):
    D, F, L = model_dim, hidden_size, n_layers
    keys = jax.random.split(key, 1 + L)

    wqkv, wo, w1, w2 = [], [], [], []
    for i in range(L):
        ks = jax.random.split(keys[1 + i], 6)
        wq, wk, wv = (0.05 * jax.random.normal(ks[j], (D, D), jnp.float32)
                      for j in range(3))
        wqkv.append(jnp.concatenate([wq, wk, wv], axis=-1))      # fused (D, 3D)
        wo.append(0.05 * jax.random.normal(ks[3], (D, D), jnp.float32))
        w1.append(0.05 * jax.random.normal(ks[4], (D, F), jnp.float32))
        w2.append(0.05 * jax.random.normal(ks[5], (F, D), jnp.float32))

    return dict(
        embedding=jax.random.normal(keys[0], (n_vocab, D), jnp.float32),
        pe=positional_encoding_table(seq_len, D),
        ln_g=jnp.ones((1, D), jnp.float32),
        ln_b=jnp.zeros((1, D), jnp.float32),
        # per-layer parameters stacked along a leading L axis; matmul weights in bf16
        wqkv=jnp.stack(wqkv).astype(jnp.bfloat16),               # (L, D, 3D)
        bqkv=jnp.zeros((L, 1, 3 * D), jnp.float32),
        wo=jnp.stack(wo).astype(jnp.bfloat16),                   # (L, D, D)
        bo=jnp.zeros((L, 1, D), jnp.float32),
        ln1g=jnp.ones((L, 1, D), jnp.float32),
        ln1b=jnp.zeros((L, 1, D), jnp.float32),
        w1=jnp.stack(w1).astype(jnp.bfloat16),                   # (L, D, F)
        b1=jnp.zeros((L, 1, F), jnp.float32),
        w2=jnp.stack(w2).astype(jnp.bfloat16),                   # (L, F, D)
        b2=jnp.zeros((L, 1, D), jnp.float32),
        ln2g=jnp.ones((L, 1, D), jnp.float32),
        ln2b=jnp.zeros((L, 1, D), jnp.float32),
    )


if __name__ == "__main__":
    # small shapes consistent with Encoder(seq_len, n_layers, n_head, hidden, p, vocab, d)
    B, S, D, H, F, L, V = 2, 8, 32, 4, 64, 2, 50

    key = jax.random.PRNGKey(0)
    k_param, k_seq = jax.random.split(key)
    params = init_params(k_param, V, S, D, H, F, L)

    src_seq = jax.random.randint(k_seq, (B, S), 0, V, dtype=jnp.int32)   # [B, S]
    # padding-style mask [B, S, S]: batch 0 attends to all 8 keys, batch 1 to first 6
    lengths = jnp.array([8, 6], dtype=jnp.int32)
    key_pos = jnp.arange(S)[None, None, :]                               # (1,1,S)
    src_mask = jnp.broadcast_to(
        (key_pos < lengths[:, None, None]).astype(jnp.float32), (B, S, S))

    (enc_out,) = encoder_forward(params, src_seq, src_mask, n_head=H, return_attns=False)
    enc_out = jax.block_until_ready(enc_out)
    assert enc_out.shape == (B, S, D)
    print("KERNEL_OK")
</pallas_src>

<mosaic_0001>
module attributes {stable_mosaic.version = 11 : i64} {
  func.func @kernel(%arg0: i32, %arg1: i32, %arg2: memref<2x8x32xf32, #tpu.memory_space<vmem>>, %arg3: memref<8x32xf32, #tpu.memory_space<vmem>>, %arg4: memref<1x32xf32, #tpu.memory_space<vmem>>, %arg5: memref<1x32xf32, #tpu.memory_space<vmem>>, %arg6: memref<2x8x8xf32, #tpu.memory_space<vmem>>, %arg7: memref<1x32x96xbf16, #tpu.memory_space<vmem>>, %arg8: memref<1x1x96xf32, #tpu.memory_space<vmem>>, %arg9: memref<1x32x32xbf16, #tpu.memory_space<vmem>>, %arg10: memref<1x1x32xf32, #tpu.memory_space<vmem>>, %arg11: memref<1x1x32xf32, #tpu.memory_space<vmem>>, %arg12: memref<1x1x32xf32, #tpu.memory_space<vmem>>, %arg13: memref<1x32x64xbf16, #tpu.memory_space<vmem>>, %arg14: memref<1x1x64xf32, #tpu.memory_space<vmem>>, %arg15: memref<1x64x32xbf16, #tpu.memory_space<vmem>>, %arg16: memref<1x1x32xf32, #tpu.memory_space<vmem>>, %arg17: memref<1x1x32xf32, #tpu.memory_space<vmem>>, %arg18: memref<1x1x32xf32, #tpu.memory_space<vmem>>, %arg19: memref<2x8x32xf32, #tpu.memory_space<vmem>>) attributes {dimension_semantics = [#tpu.dimension_semantics<parallel>, #tpu.dimension_semantics<arbitrary>], iteration_bounds = array<i64: 1, 2>, scalar_prefetch = 0 : i64, scratch_operands = 0 : i64, tpu.core_type = #tpu.core_type<tc>, window_params = [{transform_indices = @transform_0, window_bounds = array<i64: 2, 8, 32>}, {pipeline_mode = #tpu.pipeline_mode<synchronous>, transform_indices = @transform_1, window_bounds = array<i64: 8, 32>}, {pipeline_mode = #tpu.pipeline_mode<synchronous>, transform_indices = @transform_2, window_bounds = array<i64: 1, 32>}, {pipeline_mode = #tpu.pipeline_mode<synchronous>, transform_indices = @transform_3, window_bounds = array<i64: 1, 32>}, {transform_indices = @transform_4, window_bounds = array<i64: 2, 8, 8>}, {transform_indices = @transform_5, window_bounds = array<i64: 1, 32, 96>}, {transform_indices = @transform_6, window_bounds = array<i64: 1, 1, 96>}, {transform_indices = @transform_7, window_bounds = array<i64: 1, 32, 32>}, {transform_indices = @transform_8, window_bounds = array<i64: 1, 1, 32>}, {transform_indices = @transform_9, window_bounds = array<i64: 1, 1, 32>}, {transform_indices = @transform_10, window_bounds = array<i64: 1, 1, 32>}, {transform_indices = @transform_11, window_bounds = array<i64: 1, 32, 64>}, {transform_indices = @transform_12, window_bounds = array<i64: 1, 1, 64>}, {transform_indices = @transform_13, window_bounds = array<i64: 1, 64, 32>}, {transform_indices = @transform_14, window_bounds = array<i64: 1, 1, 32>}, {transform_indices = @transform_15, window_bounds = array<i64: 1, 1, 32>}, {transform_indices = @transform_16, window_bounds = array<i64: 1, 1, 32>}, {transform_indices = @transform_17, window_bounds = array<i64: 2, 8, 32>}]} {
    %c0_i32 = arith.constant 0 : i32
    %0 = arith.cmpi eq, %arg1, %c0_i32 : i32
    %1 = arith.extui %0 : i1 to i32
    %c0_i32_0 = arith.constant 0 : i32
    %2 = arith.cmpi ne, %1, %c0_i32_0 : i32
    scf.if %2 {
      %c0_94 = arith.constant 0 : index
      %c0_95 = arith.constant 0 : index
      %c0_96 = arith.constant 0 : index
      %223 = vector.load %arg2[%c0_94, %c0_95, %c0_96] : memref<2x8x32xf32, #tpu.memory_space<vmem>>, vector<2x8x32xf32>
      %c0_97 = arith.constant 0 : index
      %c0_98 = arith.constant 0 : index
      %224 = vector.load %arg3[%c0_97, %c0_98] : memref<8x32xf32, #tpu.memory_space<vmem>>, vector<8x32xf32>
      %225 = vector.shape_cast %224 : vector<8x32xf32> to vector<1x8x32xf32>
      %226 = vector.broadcast %225 : vector<1x8x32xf32> to vector<2x8x32xf32>
      %227 = arith.addf %223, %226 : vector<2x8x32xf32>
      %c0_99 = arith.constant 0 : index
      %c0_100 = arith.constant 0 : index
      %228 = vector.load %arg4[%c0_99, %c0_100] : memref<1x32xf32, #tpu.memory_space<vmem>>, vector<1x32xf32>
      %c0_101 = arith.constant 0 : index
      %c0_102 = arith.constant 0 : index
      %229 = vector.load %arg5[%c0_101, %c0_102] : memref<1x32xf32, #tpu.memory_space<vmem>>, vector<1x32xf32>
      %cst_103 = arith.constant dense<0.000000e+00> : vector<2x8xf32>
      %230 = vector.multi_reduction <add>, %227, %cst_103 [2] : vector<2x8x32xf32> to vector<2x8xf32>
      %231 = vector.shape_cast %230 : vector<2x8xf32> to vector<2x8x1xf32>
      %cst_104 = arith.constant 3.200000e+01 : f32
      %232 = vector.broadcast %cst_104 : f32 to vector<2x8x1xf32>
      %233 = arith.divf %231, %232 : vector<2x8x1xf32>
      %234 = vector.broadcast %233 : vector<2x8x1xf32> to vector<2x8x32xf32>
      %235 = arith.subf %227, %234 : vector<2x8x32xf32>
      %236 = arith.mulf %235, %235 : vector<2x8x32xf32>
      %cst_105 = arith.constant dense<0.000000e+00> : vector<2x8xf32>
      %237 = vector.multi_reduction <add>, %236, %cst_105 [2] : vector<2x8x32xf32> to vector<2x8xf32>
      %238 = vector.shape_cast %237 : vector<2x8xf32> to vector<2x8x1xf32>
      %cst_106 = arith.constant 3.200000e+01 : f32
      %239 = vector.broadcast %cst_106 : f32 to vector<2x8x1xf32>
      %240 = arith.divf %238, %239 : vector<2x8x1xf32>
      %241 = vector.broadcast %233 : vector<2x8x1xf32> to vector<2x8x32xf32>
      %242 = arith.subf %227, %241 : vector<2x8x32xf32>
      %cst_107 = arith.constant 9.99999997E-7 : f32
      %243 = vector.broadcast %cst_107 : f32 to vector<2x8x1xf32>
      %244 = arith.addf %240, %243 : vector<2x8x1xf32>
      %245 = math.rsqrt %244 : vector<2x8x1xf32>
      %246 = vector.broadcast %245 : vector<2x8x1xf32> to vector<2x8x32xf32>
      %247 = arith.mulf %242, %246 : vector<2x8x32xf32>
      %248 = vector.shape_cast %228 : vector<1x32xf32> to vector<1x1x32xf32>
      %249 = vector.broadcast %248 : vector<1x1x32xf32> to vector<2x8x32xf32>
      %250 = arith.mulf %247, %249 : vector<2x8x32xf32>
      %251 = vector.shape_cast %229 : vector<1x32xf32> to vector<1x1x32xf32>
      %252 = vector.broadcast %251 : vector<1x1x32xf32> to vector<2x8x32xf32>
      %253 = arith.addf %250, %252 : vector<2x8x32xf32>
      %c0_108 = arith.constant 0 : index
      %c0_109 = arith.constant 0 : index
      %c0_110 = arith.constant 0 : index
      %254 = vector.load %arg19[%c0_108, %c0_109, %c0_110] : memref<2x8x32xf32, #tpu.memory_space<vmem>>, vector<2x8x32xf32>
      tpu.vector_store %arg19[%c0_108, %c0_109, %c0_110], %253 {strides = array<i32>} : memref<2x8x32xf32, #tpu.memory_space<vmem>>, vector<2x8x32xf32>,
    } else {
    }
    %c0 = arith.constant 0 : index
    %c0_1 = arith.constant 0 : index
    %c0_2 = arith.constant 0 : index
    %3 = vector.load %arg19[%c0, %c0_1, %c0_2] : memref<2x8x32xf32, #tpu.memory_space<vmem>>, vector<2x8x32xf32>
    %4 = vector.shape_cast %3 : vector<2x8x32xf32> to vector<16x32xf32>
    %5 = arith.truncf %4 : vector<16x32xf32> to vector<16x32xbf16>
    %c0_3 = arith.constant 0 : index
    %c0_4 = arith.constant 0 : index
    %c0_5 = arith.constant 0 : index
    %6 = vector.load %arg7[%c0_3, %c0_4, %c0_5] : memref<1x32x96xbf16, #tpu.memory_space<vmem>>, vector<1x32x96xbf16>
    %7 = vector.shape_cast %6 : vector<1x32x96xbf16> to vector<32x96xbf16>
    %cst = arith.constant dense<0.000000e+00> : vector<16x96xf32>
    %8 = tpu.matmul %5, %7, %cst {dimension_numbers = #tpu.dot_dimension_numbers<[1], [0], [0], [1], [0, 0, 1, 1], [], []>} : vector<16x32xbf16>, vector<32x96xbf16>, vector<16x96xf32> -> vector<16x96xf32>
    %c0_6 = arith.constant 0 : index
    %c0_7 = arith.constant 0 : index
    %c0_8 = arith.constant 0 : index
    %9 = vector.load %arg8[%c0_6, %c0_7, %c0_8] : memref<1x1x96xf32, #tpu.memory_space<vmem>>, vector<1x1x96xf32>
    %10 = vector.shape_cast %9 : vector<1x1x96xf32> to vector<1x96xf32>
    %11 = vector.broadcast %10 : vector<1x96xf32> to vector<16x96xf32>
    %12 = arith.addf %8, %11 : vector<16x96xf32>
    %c0_9 = arith.constant 0 : index
    %c0_10 = arith.constant 0 : index
    %c0_11 = arith.constant 0 : index
    %13 = vector.load %arg6[%c0_9, %c0_10, %c0_11] : memref<2x8x8xf32, #tpu.memory_space<vmem>>, vector<2x8x8xf32>
    %cst_12 = arith.constant 0.000000e+00 : f32
    %14 = vector.broadcast %cst_12 : f32 to vector<2x8x8xf32>
    %15 = arith.cmpf oeq, %13, %14 : vector<2x8x8xf32>
    %cst_13 = arith.constant 0.000000e+00 : f32
    %16 = vector.broadcast %cst_13 : f32 to vector<16x32xf32>
    %17 = vector.extract_strided_slice %12 {offsets = [0, 0], sizes = [16, 8], strides = [1, 1]} : vector<16x96xf32> to vector<16x8xf32>
    %18 = vector.shape_cast %17 : vector<16x8xf32> to vector<2x8x8xf32>
    %19 = arith.truncf %18 : vector<2x8x8xf32> to vector<2x8x8xbf16>
    %20 = vector.extract_strided_slice %12 {offsets = [0, 32], sizes = [16, 8], strides = [1, 1]} : vector<16x96xf32> to vector<16x8xf32>
    %21 = vector.shape_cast %20 : vector<16x8xf32> to vector<2x8x8xf32>
    %22 = arith.truncf %21 : vector<2x8x8xf32> to vector<2x8x8xbf16>
    %23 = vector.extract_strided_slice %12 {offsets = [0, 64], sizes = [16, 8], strides = [1, 1]} : vector<16x96xf32> to vector<16x8xf32>
    %24 = vector.shape_cast %23 : vector<16x8xf32> to vector<2x8x8xf32>
    %25 = arith.truncf %24 : vector<2x8x8xf32> to vector<2x8x8xbf16>
    "tpu.trace_start"() <{level = 10 : i32, message = "bqd,bkd->bqk"}> : () -> ()
    %cst_14 = arith.constant dense<0.000000e+00> : vector<2x8x8xf32>
    %26 = tpu.matmul %19, %22, %cst_14 {dimension_numbers = #tpu.dot_dimension_numbers<[2], [2], [1], [1], [0, 0, 0, 1, 1, 1], [0], [0]>} : vector<2x8x8xbf16>, vector<2x8x8xbf16>, vector<2x8x8xf32> -> vector<2x8x8xf32>
    "tpu.trace_stop"() : () -> ()
    %cst_15 = arith.constant 0.353553385 : f32
    %27 = vector.broadcast %cst_15 : f32 to vector<2x8x8xf32>
    %28 = arith.mulf %26, %27 : vector<2x8x8xf32>
    %cst_16 = arith.constant -1.000000e+09 : f32
    %29 = vector.broadcast %cst_16 : f32 to vector<2x8x8xf32>
    %30 = arith.select %15, %29, %28 : vector<2x8x8xi1>, vector<2x8x8xf32>
    %cst_17 = arith.constant dense<0xFF800000> : vector<2x8xf32>
    %31 = vector.multi_reduction <maximumf>, %30, %cst_17 [2] : vector<2x8x8xf32> to vector<2x8xf32>
    %32 = vector.shape_cast %31 : vector<2x8xf32> to vector<2x8x1xf32>
    %33 = vector.broadcast %32 : vector<2x8x1xf32> to vector<2x8x8xf32>
    %34 = arith.subf %30, %33 : vector<2x8x8xf32>
    %35 = math.exp %34 : vector<2x8x8xf32>
    %cst_18 = arith.constant dense<0.000000e+00> : vector<2x8xf32>
    %36 = vector.multi_reduction <add>, %35, %cst_18 [2] : vector<2x8x8xf32> to vector<2x8xf32>
    %37 = vector.shape_cast %36 : vector<2x8xf32> to vector<2x8x1xf32>
    %38 = tpu.reciprocal %37 {approx = true} : vector<2x8x1xf32> -> vector<2x8x1xf32>
    %39 = vector.broadcast %38 : vector<2x8x1xf32> to vector<2x8x8xf32>
    %40 = arith.mulf %35, %39 : vector<2x8x8xf32>
    %41 = arith.truncf %40 : vector<2x8x8xf32> to vector<2x8x8xbf16>
    "tpu.trace_start"() <{level = 10 : i32, message = "bqk,bkd->bqd"}> : () -> ()
    %cst_19 = arith.constant dense<0.000000e+00> : vector<2x8x8xf32>
    %42 = tpu.matmul %41, %25, %cst_19 {dimension_numbers = #tpu.dot_dimension_numbers<[2], [1], [1], [2], [0, 0, 0, 1, 1, 2], [0], [0]>} : vector<2x8x8xbf16>, vector<2x8x8xbf16>, vector<2x8x8xf32> -> vector<2x8x8xf32>
    "tpu.trace_stop"() : () -> ()
    %43 = vector.shape_cast %42 : vector<2x8x8xf32> to vector<16x8xf32>
    %44 = arith.truncf %43 : vector<16x8xf32> to vector<16x8xbf16>
    %c0_20 = arith.constant 0 : index
    %c0_21 = arith.constant 0 : index
    %c0_22 = arith.constant 0 : index
    %45 = vector.load %arg9[%c0_20, %c0_21, %c0_22] : memref<1x32x32xbf16, #tpu.memory_space<vmem>>, vector<1x8x32xbf16>
    %46 = vector.shape_cast %45 : vector<1x8x32xbf16> to vector<8x32xbf16>
    %cst_23 = arith.constant dense<0.000000e+00> : vector<16x32xf32>
    %47 = tpu.matmul %44, %46, %cst_23 {dimension_numbers = #tpu.dot_dimension_numbers<[1], [0], [0], [1], [0, 0, 1, 1], [], []>} : vector<16x8xbf16>, vector<8x32xbf16>, vector<16x32xf32> -> vector<16x32xf32>
    %48 = arith.addf %16, %47 : vector<16x32xf32>
    %49 = vector.extract_strided_slice %12 {offsets = [0, 8], sizes = [16, 8], strides = [1, 1]} : vector<16x96xf32> to vector<16x8xf32>
    %50 = vector.shape_cast %49 : vector<16x8xf32> to vector<2x8x8xf32>
    %51 = arith.truncf %50 : vector<2x8x8xf32> to vector<2x8x8xbf16>
    %52 = vector.extract_strided_slice %12 {offsets = [0, 40], sizes = [16, 8], strides = [1, 1]} : vector<16x96xf32> to vector<16x8xf32>
    %53 = vector.shape_cast %52 : vector<16x8xf32> to vector<2x8x8xf32>
    %54 = arith.truncf %53 : vector<2x8x8xf32> to vector<2x8x8xbf16>
    %55 = vector.extract_strided_slice %12 {offsets = [0, 72], sizes = [16, 8], strides = [1, 1]} : vector<16x96xf32> to vector<16x8xf32>
    %56 = vector.shape_cast %55 : vector<16x8xf32> to vector<2x8x8xf32>
    %57 = arith.truncf %56 : vector<2x8x8xf32> to vector<2x8x8xbf16>
    "tpu.trace_start"() <{level = 10 : i32, message = "bqd,bkd->bqk"}> : () -> ()
    %cst_24 = arith.constant dense<0.000000e+00> : vector<2x8x8xf32>
    %58 = tpu.matmul %51, %54, %cst_24 {dimension_numbers = #tpu.dot_dimension_numbers<[2], [2], [1], [1], [0, 0, 0, 1, 1, 1], [0], [0]>} : vector<2x8x8xbf16>, vector<2x8x8xbf16>, vector<2x8x8xf32> -> vector<2x8x8xf32>
    "tpu.trace_stop"() : () -> ()
    %cst_25 = arith.constant 0.353553385 : f32
    %59 = vector.broadcast %cst_25 : f32 to vector<2x8x8xf32>
    %60 = arith.mulf %58, %59 : vector<2x8x8xf32>
    %cst_26 = arith.constant -1.000000e+09 : f32
    %61 = vector.broadcast %cst_26 : f32 to vector<2x8x8xf32>
    %62 = arith.select %15, %61, %60 : vector<2x8x8xi1>, vector<2x8x8xf32>
    %cst_27 = arith.constant dense<0xFF800000> : vector<2x8xf32>
    %63 = vector.multi_reduction <maximumf>, %62, %cst_27 [2] : vector<2x8x8xf32> to vector<2x8xf32>
    %64 = vector.shape_cast %63 : vector<2x8xf32> to vector<2x8x1xf32>
    %65 = vector.broadcast %64 : vector<2x8x1xf32> to vector<2x8x8xf32>
    %66 = arith.subf %62, %65 : vector<2x8x8xf32>
    %67 = math.exp %66 : vector<2x8x8xf32>
    %cst_28 = arith.constant dense<0.000000e+00> : vector<2x8xf32>
    %68 = vector.multi_reduction <add>, %67, %cst_28 [2] : vector<2x8x8xf32> to vector<2x8xf32>
    %69 = vector.shape_cast %68 : vector<2x8xf32> to vector<2x8x1xf32>
    %70 = tpu.reciprocal %69 {approx = true} : vector<2x8x1xf32> -> vector<2x8x1xf32>
    %71 = vector.broadcast %70 : vector<2x8x1xf32> to vector<2x8x8xf32>
    %72 = arith.mulf %67, %71 : vector<2x8x8xf32>
    %73 = arith.truncf %72 : vector<2x8x8xf32> to vector<2x8x8xbf16>
    "tpu.trace_start"() <{level = 10 : i32, message = "bqk,bkd->bqd"}> : () -> ()
    %cst_29 = arith.constant dense<0.000000e+00> : vector<2x8x8xf32>
    %74 = tpu.matmul %73, %57, %cst_29 {dimension_numbers = #tpu.dot_dimension_numbers<[2], [1], [1], [2], [0, 0, 0, 1, 1, 2], [0], [0]>} : vector<2x8x8xbf16>, vector<2x8x8xbf16>, vector<2x8x8xf32> -> vector<2x8x8xf32>
    "tpu.trace_stop"() : () -> ()
    %75 = vector.shape_cast %74 : vector<2x8x8xf32> to vector<16x8xf32>
    %76 = arith.truncf %75 : vector<16x8xf32> to vector<16x8xbf16>
    %c0_30 = arith.constant 0 : index
    %c8 = arith.constant 8 : index
    %c0_31 = arith.constant 0 : index
    %77 = vector.load %arg9[%c0_30, %c8, %c0_31] : memref<1x32x32xbf16, #tpu.memory_space<vmem>>, vector<1x8x32xbf16>
    %78 = vector.shape_cast %77 : vector<1x8x32xbf16> to vector<8x32xbf16>
    %cst_32 = arith.constant dense<0.000000e+00> : vector<16x32xf32>
    %79 = tpu.matmul %76, %78, %cst_32 {dimension_numbers = #tpu.dot_dimension_numbers<[1], [0], [0], [1], [0, 0, 1, 1], [], []>} : vector<16x8xbf16>, vector<8x32xbf16>, vector<16x32xf32> -> vector<16x32xf32>
    %80 = arith.addf %48, %79 : vector<16x32xf32>
    %81 = vector.extract_strided_slice %12 {offsets = [0, 16], sizes = [16, 8], strides = [1, 1]} : vector<16x96xf32> to vector<16x8xf32>
    %82 = vector.shape_cast %81 : vector<16x8xf32> to vector<2x8x8xf32>
    %83 = arith.truncf %82 : vector<2x8x8xf32> to vector<2x8x8xbf16>
    %84 = vector.extract_strided_slice %12 {offsets = [0, 48], sizes = [16, 8], strides = [1, 1]} : vector<16x96xf32> to vector<16x8xf32>
    %85 = vector.shape_cast %84 : vector<16x8xf32> to vector<2x8x8xf32>
    %86 = arith.truncf %85 : vector<2x8x8xf32> to vector<2x8x8xbf16>
    %87 = vector.extract_strided_slice %12 {offsets = [0, 80], sizes = [16, 8], strides = [1, 1]} : vector<16x96xf32> to vector<16x8xf32>
    %88 = vector.shape_cast %87 : vector<16x8xf32> to vector<2x8x8xf32>
    %89 = arith.truncf %88 : vector<2x8x8xf32> to vector<2x8x8xbf16>
    "tpu.trace_start"() <{level = 10 : i32, message = "bqd,bkd->bqk"}> : () -> ()
    %cst_33 = arith.constant dense<0.000000e+00> : vector<2x8x8xf32>
    %90 = tpu.matmul %83, %86, %cst_33 {dimension_numbers = #tpu.dot_dimension_numbers<[2], [2], [1], [1], [0, 0, 0, 1, 1, 1], [0], [0]>} : vector<2x8x8xbf16>, vector<2x8x8xbf16>, vector<2x8x8xf32> -> vector<2x8x8xf32>
    "tpu.trace_stop"() : () -> ()
    %cst_34 = arith.constant 0.353553385 : f32
    %91 = vector.broadcast %cst_34 : f32 to vector<2x8x8xf32>
    %92 = arith.mulf %90, %91 : vector<2x8x8xf32>
    %cst_35 = arith.constant -1.000000e+09 : f32
    %93 = vector.broadcast %cst_35 : f32 to vector<2x8x8xf32>
    %94 = arith.select %15, %93, %92 : vector<2x8x8xi1>, vector<2x8x8xf32>
    %cst_36 = arith.constant dense<0xFF800000> : vector<2x8xf32>
    %95 = vector.multi_reduction <maximumf>, %94, %cst_36 [2] : vector<2x8x8xf32> to vector<2x8xf32>
    %96 = vector.shape_cast %95 : vector<2x8xf32> to vector<2x8x1xf32>
    %97 = vector.broadcast %96 : vector<2x8x1xf32> to vector<2x8x8xf32>
    %98 = arith.subf %94, %97 : vector<2x8x8xf32>
    %99 = math.exp %98 : vector<2x8x8xf32>
    %cst_37 = arith.constant dense<0.000000e+00> : vector<2x8xf32>
    %100 = vector.multi_reduction <add>, %99, %cst_37 [2] : vector<2x8x8xf32> to vector<2x8xf32>
    %101 = vector.shape_cast %100 : vector<2x8xf32> to vector<2x8x1xf32>
    %102 = tpu.reciprocal %101 {approx = true} : vector<2x8x1xf32> -> vector<2x8x1xf32>
    %103 = vector.broadcast %102 : vector<2x8x1xf32> to vector<2x8x8xf32>
    %104 = arith.mulf %99, %103 : vector<2x8x8xf32>
    %105 = arith.truncf %104 : vector<2x8x8xf32> to vector<2x8x8xbf16>
    "tpu.trace_start"() <{level = 10 : i32, message = "bqk,bkd->bqd"}> : () -> ()
    %cst_38 = arith.constant dense<0.000000e+00> : vector<2x8x8xf32>
    %106 = tpu.matmul %105, %89, %cst_38 {dimension_numbers = #tpu.dot_dimension_numbers<[2], [1], [1], [2], [0, 0, 0, 1, 1, 2], [0], [0]>} : vector<2x8x8xbf16>, vector<2x8x8xbf16>, vector<2x8x8xf32> -> vector<2x8x8xf32>
    "tpu.trace_stop"() : () -> ()
    %107 = vector.shape_cast %106 : vector<2x8x8xf32> to vector<16x8xf32>
    %108 = arith.truncf %107 : vector<16x8xf32> to vector<16x8xbf16>
    %c0_39 = arith.constant 0 : index
    %c16 = arith.constant 16 : index
    %c0_40 = arith.constant 0 : index
    %109 = vector.load %arg9[%c0_39, %c16, %c0_40] : memref<1x32x32xbf16, #tpu.memory_space<vmem>>, vector<1x8x32xbf16>
    %110 = vector.shape_cast %109 : vector<1x8x32xbf16> to vector<8x32xbf16>
    %cst_41 = arith.constant dense<0.000000e+00> : vector<16x32xf32>
    %111 = tpu.matmul %108, %110, %cst_41 {dimension_numbers = #tpu.dot_dimension_numbers<[1], [0], [0], [1], [0, 0, 1, 1], [], []>} : vector<16x8xbf16>, vector<8x32xbf16>, vector<16x32xf32> -> vector<16x32xf32>
    %112 = arith.addf %80, %111 : vector<16x32xf32>
    %113 = vector.extract_strided_slice %12 {offsets = [0, 24], sizes = [16, 8], strides = [1, 1]} : vector<16x96xf32> to vector<16x8xf32>
    %114 = vector.shape_cast %113 : vector<16x8xf32> to vector<2x8x8xf32>
    %115 = arith.truncf %114 : vector<2x8x8xf32> to vector<2x8x8xbf16>
    %116 = vector.extract_strided_slice %12 {offsets = [0, 56], sizes = [16, 8], strides = [1, 1]} : vector<16x96xf32> to vector<16x8xf32>
    %117 = vector.shape_cast %116 : vector<16x8xf32> to vector<2x8x8xf32>
    %118 = arith.truncf %117 : vector<2x8x8xf32> to vector<2x8x8xbf16>
    %119 = vector.extract_strided_slice %12 {offsets = [0, 88], sizes = [16, 8], strides = [1, 1]} : vector<16x96xf32> to vector<16x8xf32>
    %120 = vector.shape_cast %119 : vector<16x8xf32> to vector<2x8x8xf32>
    %121 = arith.truncf %120 : vector<2x8x8xf32> to vector<2x8x8xbf16>
    "tpu.trace_start"() <{level = 10 : i32, message = "bqd,bkd->bqk"}> : () -> ()
    %cst_42 = arith.constant dense<0.000000e+00> : vector<2x8x8xf32>
    %122 = tpu.matmul %115, %118, %cst_42 {dimension_numbers = #tpu.dot_dimension_numbers<[2], [2], [1], [1], [0, 0, 0, 1, 1, 1], [0], [0]>} : vector<2x8x8xbf16>, vector<2x8x8xbf16>, vector<2x8x8xf32> -> vector<2x8x8xf32>
    "tpu.trace_stop"() : () -> ()
    %cst_43 = arith.constant 0.353553385 : f32
    %123 = vector.broadcast %cst_43 : f32 to vector<2x8x8xf32>
    %124 = arith.mulf %122, %123 : vector<2x8x8xf32>
    %cst_44 = arith.constant -1.000000e+09 : f32
    %125 = vector.broadcast %cst_44 : f32 to vector<2x8x8xf32>
    %126 = arith.select %15, %125, %124 : vector<2x8x8xi1>, vector<2x8x8xf32>
    %cst_45 = arith.constant dense<0xFF800000> : vector<2x8xf32>
    %127 = vector.multi_reduction <maximumf>, %126, %cst_45 [2] : vector<2x8x8xf32> to vector<2x8xf32>
    %128 = vector.shape_cast %127 : vector<2x8xf32> to vector<2x8x1xf32>
    %129 = vector.broadcast %128 : vector<2x8x1xf32> to vector<2x8x8xf32>
    %130 = arith.subf %126, %129 : vector<2x8x8xf32>
    %131 = math.exp %130 : vector<2x8x8xf32>
    %cst_46 = arith.constant dense<0.000000e+00> : vector<2x8xf32>
    %132 = vector.multi_reduction <add>, %131, %cst_46 [2] : vector<2x8x8xf32> to vector<2x8xf32>
    %133 = vector.shape_cast %132 : vector<2x8xf32> to vector<2x8x1xf32>
    %134 = tpu.reciprocal %133 {approx = true} : vector<2x8x1xf32> -> vector<2x8x1xf32>
    %135 = vector.broadcast %134 : vector<2x8x1xf32> to vector<2x8x8xf32>
    %136 = arith.mulf %131, %135 : vector<2x8x8xf32>
    %137 = arith.truncf %136 : vector<2x8x8xf32> to vector<2x8x8xbf16>
    "tpu.trace_start"() <{level = 10 : i32, message = "bqk,bkd->bqd"}> : () -> ()
    %cst_47 = arith.constant dense<0.000000e+00> : vector<2x8x8xf32>
    %138 = tpu.matmul %137, %121, %cst_47 {dimension_numbers = #tpu.dot_dimension_numbers<[2], [1], [1], [2], [0, 0, 0, 1, 1, 2], [0], [0]>} : vector<2x8x8xbf16>, vector<2x8x8xbf16>, vector<2x8x8xf32> -> vector<2x8x8xf32>
    "tpu.trace_stop"() : () -> ()
    %139 = vector.shape_cast %138 : vector<2x8x8xf32> to vector<16x8xf32>
    %140 = arith.truncf %139 : vector<16x8xf32> to vector<16x8xbf16>
    %c0_48 = arith.constant 0 : index
    %c24 = arith.constant 24 : index
    %c0_49 = arith.constant 0 : index
    %141 = vector.load %arg9[%c0_48, %c24, %c0_49] : memref<1x32x32xbf16, #tpu.memory_space<vmem>>, vector<1x8x32xbf16>
    %142 = vector.shape_cast %141 : vector<1x8x32xbf16> to vector<8x32xbf16>
    %cst_50 = arith.constant dense<0.000000e+00> : vector<16x32xf32>
    %143 = tpu.matmul %140, %142, %cst_50 {dimension_numbers = #tpu.dot_dimension_numbers<[1], [0], [0], [1], [0, 0, 1, 1], [], []>} : vector<16x8xbf16>, vector<8x32xbf16>, vector<16x32xf32> -> vector<16x32xf32>
    %144 = arith.addf %112, %143 : vector<16x32xf32>
    %c0_51 = arith.constant 0 : index
    %c0_52 = arith.constant 0 : index
    %c0_53 = arith.constant 0 : index
    %145 = vector.load %arg10[%c0_51, %c0_52, %c0_53] : memref<1x1x32xf32, #tpu.memory_space<vmem>>, vector<1x1x32xf32>
    %146 = vector.shape_cast %145 : vector<1x1x32xf32> to vector<1x32xf32>
    %147 = vector.broadcast %146 : vector<1x32xf32> to vector<16x32xf32>
    %148 = arith.addf %144, %147 : vector<16x32xf32>
    %149 = arith.addf %148, %4 : vector<16x32xf32>
    %c0_54 = arith.constant 0 : index
    %c0_55 = arith.constant 0 : index
    %c0_56 = arith.constant 0 : index
    %150 = vector.load %arg11[%c0_54, %c0_55, %c0_56] : memref<1x1x32xf32, #tpu.memory_space<vmem>>, vector<1x1x32xf32>
    %151 = vector.shape_cast %150 : vector<1x1x32xf32> to vector<1x32xf32>
    %c0_57 = arith.constant 0 : index
    %c0_58 = arith.constant 0 : index
    %c0_59 = arith.constant 0 : index
    %152 = vector.load %arg12[%c0_57, %c0_58, %c0_59] : memref<1x1x32xf32, #tpu.memory_space<vmem>>, vector<1x1x32xf32>
    %153 = vector.shape_cast %152 : vector<1x1x32xf32> to vector<1x32xf32>
    %cst_60 = arith.constant dense<0.000000e+00> : vector<16xf32>
    %154 = vector.multi_reduction <add>, %149, %cst_60 [1] : vector<16x32xf32> to vector<16xf32>
    %155 = vector.shape_cast %154 : vector<16xf32> to vector<16x1xf32>
    %cst_61 = arith.constant 3.200000e+01 : f32
    %156 = vector.broadcast %cst_61 : f32 to vector<16x1xf32>
    %157 = arith.divf %155, %156 : vector<16x1xf32>
    %158 = vector.broadcast %157 : vector<16x1xf32> to vector<16x32xf32>
    %159 = arith.subf %149, %158 : vector<16x32xf32>
    %160 = arith.mulf %159, %159 : vector<16x32xf32>
    %cst_62 = arith.constant dense<0.000000e+00> : vector<16xf32>
    %161 = vector.multi_reduction <add>, %160, %cst_62 [1] : vector<16x32xf32> to vector<16xf32>
    %162 = vector.shape_cast %161 : vector<16xf32> to vector<16x1xf32>
    %cst_63 = arith.constant 3.200000e+01 : f32
    %163 = vector.broadcast %cst_63 : f32 to vector<16x1xf32>
    %164 = arith.divf %162, %163 : vector<16x1xf32>
    %165 = vector.broadcast %157 : vector<16x1xf32> to vector<16x32xf32>
    %166 = arith.subf %149, %165 : vector<16x32xf32>
    %cst_64 = arith.constant 9.99999997E-7 : f32
    %167 = vector.broadcast %cst_64 : f32 to vector<16x1xf32>
    %168 = arith.addf %164, %167 : vector<16x1xf32>
    %169 = math.rsqrt %168 : vector<16x1xf32>
    %170 = vector.broadcast %169 : vector<16x1xf32> to vector<16x32xf32>
    %171 = arith.mulf %166, %170 : vector<16x32xf32>
    %172 = vector.broadcast %151 : vector<1x32xf32> to vector<16x32xf32>
    %173 = arith.mulf %171, %172 : vector<16x32xf32>
    %174 = vector.broadcast %153 : vector<1x32xf32> to vector<16x32xf32>
    %175 = arith.addf %173, %174 : vector<16x32xf32>
    %176 = arith.truncf %175 : vector<16x32xf32> to vector<16x32xbf16>
    %c0_65 = arith.constant 0 : index
    %c0_66 = arith.constant 0 : index
    %c0_67 = arith.constant 0 : index
    %177 = vector.load %arg13[%c0_65, %c0_66, %c0_67] : memref<1x32x64xbf16, #tpu.memory_space<vmem>>, vector<1x32x64xbf16>
    %178 = vector.shape_cast %177 : vector<1x32x64xbf16> to vector<32x64xbf16>
    %cst_68 = arith.constant dense<0.000000e+00> : vector<16x64xf32>
    %179 = tpu.matmul %176, %178, %cst_68 {dimension_numbers = #tpu.dot_dimension_numbers<[1], [0], [0], [1], [0, 0, 1, 1], [], []>} : vector<16x32xbf16>, vector<32x64xbf16>, vector<16x64xf32> -> vector<16x64xf32>
    %c0_69 = arith.constant 0 : index
    %c0_70 = arith.constant 0 : index
    %c0_71 = arith.constant 0 : index
    %180 = vector.load %arg14[%c0_69, %c0_70, %c0_71] : memref<1x1x64xf32, #tpu.memory_space<vmem>>, vector<1x1x64xf32>
    %181 = vector.shape_cast %180 : vector<1x1x64xf32> to vector<1x64xf32>
    %182 = vector.broadcast %181 : vector<1x64xf32> to vector<16x64xf32>
    %183 = arith.addf %179, %182 : vector<16x64xf32>
    %cst_72 = arith.constant 0.000000e+00 : f32
    %184 = vector.broadcast %cst_72 : f32 to vector<16x64xf32>
    %185 = arith.maximumf %183, %184 : vector<16x64xf32>
    %186 = arith.truncf %185 : vector<16x64xf32> to vector<16x64xbf16>
    %c0_73 = arith.constant 0 : index
    %c0_74 = arith.constant 0 : index
    %c0_75 = arith.constant 0 : index
    %187 = vector.load %arg15[%c0_73, %c0_74, %c0_75] : memref<1x64x32xbf16, #tpu.memory_space<vmem>>, vector<1x64x32xbf16>
    %188 = vector.shape_cast %187 : vector<1x64x32xbf16> to vector<64x32xbf16>
    %cst_76 = arith.constant dense<0.000000e+00> : vector<16x32xf32>
    %189 = tpu.matmul %186, %188, %cst_76 {dimension_numbers = #tpu.dot_dimension_numbers<[1], [0], [0], [1], [0, 0, 1, 1], [], []>} : vector<16x64xbf16>, vector<64x32xbf16>, vector<16x32xf32> -> vector<16x32xf32>
    %c0_77 = arith.constant 0 : index
    %c0_78 = arith.constant 0 : index
    %c0_79 = arith.constant 0 : index
    %190 = vector.load %arg16[%c0_77, %c0_78, %c0_79] : memref<1x1x32xf32, #tpu.memory_space<vmem>>, vector<1x1x32xf32>
    %191 = vector.shape_cast %190 : vector<1x1x32xf32> to vector<1x32xf32>
    %192 = vector.broadcast %191 : vector<1x32xf32> to vector<16x32xf32>
    %193 = arith.addf %189, %192 : vector<16x32xf32>
    %194 = arith.addf %193, %175 : vector<16x32xf32>
    %c0_80 = arith.constant 0 : index
    %c0_81 = arith.constant 0 : index
    %c0_82 = arith.constant 0 : index
    %195 = vector.load %arg17[%c0_80, %c0_81, %c0_82] : memref<1x1x32xf32, #tpu.memory_space<vmem>>, vector<1x1x32xf32>
    %196 = vector.shape_cast %195 : vector<1x1x32xf32> to vector<1x32xf32>
    %c0_83 = arith.constant 0 : index
    %c0_84 = arith.constant 0 : index
    %c0_85 = arith.constant 0 : index
    %197 = vector.load %arg18[%c0_83, %c0_84, %c0_85] : memref<1x1x32xf32, #tpu.memory_space<vmem>>, vector<1x1x32xf32>
    %198 = vector.shape_cast %197 : vector<1x1x32xf32> to vector<1x32xf32>
    %cst_86 = arith.constant dense<0.000000e+00> : vector<16xf32>
    %199 = vector.multi_reduction <add>, %194, %cst_86 [1] : vector<16x32xf32> to vector<16xf32>
    %200 = vector.shape_cast %199 : vector<16xf32> to vector<16x1xf32>
    %cst_87 = arith.constant 3.200000e+01 : f32
    %201 = vector.broadcast %cst_87 : f32 to vector<16x1xf32>
    %202 = arith.divf %200, %201 : vector<16x1xf32>
    %203 = vector.broadcast %202 : vector<16x1xf32> to vector<16x32xf32>
    %204 = arith.subf %194, %203 : vector<16x32xf32>
    %205 = arith.mulf %204, %204 : vector<16x32xf32>
    %cst_88 = arith.constant dense<0.000000e+00> : vector<16xf32>
    %206 = vector.multi_reduction <add>, %205, %cst_88 [1] : vector<16x32xf32> to vector<16xf32>
    %207 = vector.shape_cast %206 : vector<16xf32> to vector<16x1xf32>
    %cst_89 = arith.constant 3.200000e+01 : f32
    %208 = vector.broadcast %cst_89 : f32 to vector<16x1xf32>
    %209 = arith.divf %207, %208 : vector<16x1xf32>
    %210 = vector.broadcast %202 : vector<16x1xf32> to vector<16x32xf32>
    %211 = arith.subf %194, %210 : vector<16x32xf32>
    %cst_90 = arith.constant 9.99999997E-7 : f32
    %212 = vector.broadcast %cst_90 : f32 to vector<16x1xf32>
    %213 = arith.addf %209, %212 : vector<16x1xf32>
    %214 = math.rsqrt %213 : vector<16x1xf32>
    %215 = vector.broadcast %214 : vector<16x1xf32> to vector<16x32xf32>
    %216 = arith.mulf %211, %215 : vector<16x32xf32>
    %217 = vector.broadcast %196 : vector<1x32xf32> to vector<16x32xf32>
    %218 = arith.mulf %216, %217 : vector<16x32xf32>
    %219 = vector.broadcast %198 : vector<1x32xf32> to vector<16x32xf32>
    %220 = arith.addf %218, %219 : vector<16x32xf32>
    %221 = vector.shape_cast %220 : vector<16x32xf32> to vector<2x8x32xf32>
    %c0_91 = arith.constant 0 : index
    %c0_92 = arith.constant 0 : index
    %c0_93 = arith.constant 0 : index
    %222 = vector.load %arg19[%c0_91, %c0_92, %c0_93] : memref<2x8x32xf32, #tpu.memory_space<vmem>>, vector<2x8x32xf32>
    tpu.vector_store %arg19[%c0_91, %c0_92, %c0_93], %221 {strides = array<i32>} : memref<2x8x32xf32, #tpu.memory_space<vmem>>, vector<2x8x32xf32>,
    return
  }
  func.func @transform_0(%arg0: i32, %arg1: i32) -> (i32, i32, i32) {
    %c0_i32 = arith.constant 0 : i32
    %c0_i32_0 = arith.constant 0 : i32
    %c0_i32_1 = arith.constant 0 : i32
    return %arg0, %c0_i32, %c0_i32_0 : i32, i32, i32
  }
  func.func @transform_1(%arg0: i32, %arg1: i32) -> (i32, i32) {
    %c0_i32 = arith.constant 0 : i32
    %c0_i32_0 = arith.constant 0 : i32
    %c0_i32_1 = arith.constant 0 : i32
    return %c0_i32, %c0_i32_0 : i32, i32
  }
  func.func @transform_2(%arg0: i32, %arg1: i32) -> (i32, i32) {
    %c0_i32 = arith.constant 0 : i32
    %c0_i32_0 = arith.constant 0 : i32
    %c0_i32_1 = arith.constant 0 : i32
    return %c0_i32, %c0_i32_0 : i32, i32
  }
  func.func @transform_3(%arg0: i32, %arg1: i32) -> (i32, i32) {
    %c0_i32 = arith.constant 0 : i32
    %c0_i32_0 = arith.constant 0 : i32
    %c0_i32_1 = arith.constant 0 : i32
    return %c0_i32, %c0_i32_0 : i32, i32
  }
  func.func @transform_4(%arg0: i32, %arg1: i32) -> (i32, i32, i32) {
    %c0_i32 = arith.constant 0 : i32
    %c0_i32_0 = arith.constant 0 : i32
    %c0_i32_1 = arith.constant 0 : i32
    return %arg0, %c0_i32, %c0_i32_0 : i32, i32, i32
  }
  func.func @transform_5(%arg0: i32, %arg1: i32) -> (i32, i32, i32) {
    %c0_i32 = arith.constant 0 : i32
    %c0_i32_0 = arith.constant 0 : i32
    %c0_i32_1 = arith.constant 0 : i32
    return %arg1, %c0_i32, %c0_i32_0 : i32, i32, i32
  }
  func.func @transform_6(%arg0: i32, %arg1: i32) -> (i32, i32, i32) {
    %c0_i32 = arith.constant 0 : i32
    %c0_i32_0 = arith.constant 0 : i32
    %c0_i32_1 = arith.constant 0 : i32
    return %arg1, %c0_i32, %c0_i32_0 : i32, i32, i32
  }
  func.func @transform_7(%arg0: i32, %arg1: i32) -> (i32, i32, i32) {
    %c0_i32 = arith.constant 0 : i32
    %c0_i32_0 = arith.constant 0 : i32
    %c0_i32_1 = arith.constant 0 : i32
    return %arg1, %c0_i32, %c0_i32_0 : i32, i32, i32
  }
  func.func @transform_8(%arg0: i32, %arg1: i32) -> (i32, i32, i32) {
    %c0_i32 = arith.constant 0 : i32
    %c0_i32_0 = arith.constant 0 : i32
    %c0_i32_1 = arith.constant 0 : i32
    return %arg1, %c0_i32, %c0_i32_0 : i32, i32, i32
  }
  func.func @transform_9(%arg0: i32, %arg1: i32) -> (i32, i32, i32) {
    %c0_i32 = arith.constant 0 : i32
    %c0_i32_0 = arith.constant 0 : i32
    %c0_i32_1 = arith.constant 0 : i32
    return %arg1, %c0_i32, %c0_i32_0 : i32, i32, i32
  }
  func.func @transform_10(%arg0: i32, %arg1: i32) -> (i32, i32, i32) {
    %c0_i32 = arith.constant 0 : i32
    %c0_i32_0 = arith.constant 0 : i32
    %c0_i32_1 = arith.constant 0 : i32
    return %arg1, %c0_i32, %c0_i32_0 : i32, i32, i32
  }
  func.func @transform_11(%arg0: i32, %arg1: i32) -> (i32, i32, i32) {
    %c0_i32 = arith.constant 0 : i32
    %c0_i32_0 = arith.constant 0 : i32
    %c0_i32_1 = arith.constant 0 : i32
    return %arg1, %c0_i32, %c0_i32_0 : i32, i32, i32
  }
  func.func @transform_12(%arg0: i32, %arg1: i32) -> (i32, i32, i32) {
    %c0_i32 = arith.constant 0 : i32
    %c0_i32_0 = arith.constant 0 : i32
    %c0_i32_1 = arith.constant 0 : i32
    return %arg1, %c0_i32, %c0_i32_0 : i32, i32, i32
  }
  func.func @transform_13(%arg0: i32, %arg1: i32) -> (i32, i32, i32) {
    %c0_i32 = arith.constant 0 : i32
    %c0_i32_0 = arith.constant 0 : i32
    %c0_i32_1 = arith.constant 0 : i32
    return %arg1, %c0_i32, %c0_i32_0 : i32, i32, i32
  }
  func.func @transform_14(%arg0: i32, %arg1: i32) -> (i32, i32, i32) {
    %c0_i32 = arith.constant 0 : i32
    %c0_i32_0 = arith.constant 0 : i32
    %c0_i32_1 = arith.constant 0 : i32
    return %arg1, %c0_i32, %c0_i32_0 : i32, i32, i32
  }
  func.func @transform_15(%arg0: i32, %arg1: i32) -> (i32, i32, i32) {
    %c0_i32 = arith.constant 0 : i32
    %c0_i32_0 = arith.constant 0 : i32
    %c0_i32_1 = arith.constant 0 : i32
    return %arg1, %c0_i32, %c0_i32_0 : i32, i32, i32
  }
  func.func @transform_16(%arg0: i32, %arg1: i32) -> (i32, i32, i32) {
    %c0_i32 = arith.constant 0 : i32
    %c0_i32_0 = arith.constant 0 : i32
    %c0_i32_1 = arith.constant 0 : i32
    return %arg1, %c0_i32, %c0_i32_0 : i32, i32, i32
  }
  func.func @transform_17(%arg0: i32, %arg1: i32) -> (i32, i32, i32) {
    %c0_i32 = arith.constant 0 : i32
    %c0_i32_0 = arith.constant 0 : i32
    %c0_i32_1 = arith.constant 0 : i32
    return %arg0, %c0_i32, %c0_i32_0 : i32, i32, i32
  }
}

</mosaic_0001>

<bundles_post_ra>
// kernel: tpu_custom_call.1
= control target key start
LH: loop header
LB: loop body
LE: loop exit
PB: predicated region body
PF: predicated region fallthrough
CT: control target
= control target key end

     0   :  { %s3732_s0 = inlined_call_operand.hbm [shape: f32[2,8,32], index: 0, kind: input, shape index: {}]   ;;  %s3733_s1 = inlined_call_operand.hbm [shape: f32[8,32], index: 1, kind: input, shape index: {}]   ;;  %s3734_s2 = inlined_call_operand.vmem [shape: f32[1,32], index: 2, kind: input, shape index: {}]   ;;  %s3735_s3 = inlined_call_operand.hbm [shape: f32[1,32], index: 3, kind: input, shape index: {}]   ;;  %s3736_s4 = inlined_call_operand.hbm [shape: f32[2,8,8], index: 4, kind: input, shape index: {}]   ;;  %s3737_s5 = inlined_call_operand.vmem [shape: bf16[2,32,96], index: 5, kind: input, shape index: {}]   ;;  %s3738_s6 = inlined_call_operand.vmem [shape: f32[2,1,96], index: 6, kind: input, shape index: {}]   ;;  %s3739_s7 = inlined_call_operand.vmem [shape: bf16[2,32,32], index: 7, kind: input, shape index: {}]   ;;  %s3740_s8 = inlined_call_operand.vmem [shape: f32[2,1,32], index: 8, kind: input, shape index: {}]   ;;  %s3741_s9 = inlined_call_operand.vmem [shape: f32[2,1,32], index: 9, kind: input, shape index: {}]   ;;  %s3742_s10 = inlined_call_operand.vmem [shape: f32[2,1,32], index: 10, kind: input, shape index: {}]   ;;  %s3743_s11 = inlined_call_operand.vmem [shape: bf16[2,32,64], index: 11, kind: input, shape index: {}]   ;;  %s3744_s12 = inlined_call_operand.vmem [shape: f32[2,1,64], index: 12, kind: input, shape index: {}]   ;;  %s3745_s13 = inlined_call_operand.vmem [shape: bf16[2,64,32], index: 13, kind: input, shape index: {}]   ;;  %s3746_s14 = inlined_call_operand.vmem [shape: f32[2,1,32], index: 14, kind: input, shape index: {}]   ;;  %s3747_s15 = inlined_call_operand.vmem [shape: f32[2,1,32], index: 15, kind: input, shape index: {}]   ;;  %s3748_s16 = inlined_call_operand.vmem [shape: f32[2,1,32], index: 16, kind: input, shape index: {}]   ;;  %s3749_s17 = inlined_call_operand.hbm [shape: f32[2,8,32], index: 17, kind: output, shape index: {}]  }
   0x1   :  { %3760 = sst [smem:[#allocation18_spill]] %s3732_s0 }
   0x2   :  { %3761 = sst [smem:[#allocation19_spill]] %s3733_s1 }
   0x3   :  { %3762 = sst [smem:[#allocation20_spill]] %s3734_s2 }
   0x4   :  { %3763 = sst [smem:[#allocation21_spill]] %s3735_s3 }
   0x5   :  { %3764 = sst [smem:[#allocation22_spill]] %s3736_s4 }
   0x6   :  { %3765 = sst [smem:[#allocation23_spill]] %s3737_s5 }
   0x7   :  { %3766 = sst [smem:[#allocation24_spill]] %s3739_s7 }
   0x8   :  { %3767 = sst [smem:[#allocation25_spill]] %s3743_s11 }
   0x9   :  { %3768 = sst [smem:[#allocation26_spill]] %s3744_s12 }
   0xa   :  { %3769 = sst [smem:[#allocation27_spill]] %s3745_s13 }
   0xb   :  { %3770 = sst [smem:[#allocation28_spill]] %s3746_s14 }
   0xc   :  { %3771 = sst [smem:[#allocation29_spill]] %s3747_s15 }
   0xd   :  { %3772 = sst [smem:[#allocation30_spill]] %s3748_s16 }
   0xe   :  { %3773 = sst [smem:[#allocation31_spill]] %s3749_s17 }
   0xf   :  { %22 = vsyncpa [#allocation3], 0 }
  0x10   :  { %23 = vsyncpa [#allocation6], 0 }
  0x11   :  { %24 = vsyncpa [#allocation9], 0 }
  0x12   :  { %25 = vsyncpa [#allocation4], 0  ;;  %s3203_s24 = smov 0   ;;  %s3205_s25 = smov 0  }
  0x13   :  { %s3207_s26 = smov 0  }
  0x14 LB: > { %3774 = sst [smem:[#allocation15_spill]] %s3085_s25  ;;  %s3091_s27 = smov [#allocation5]   ;;  %s3089_s26 = sphi %s3207_s26, %s31_s26   ;;  %s3085_s25 = sphi %s3205_s25, %s3812_s25   ;;  %s3081_s24 = sphi %s3203_s24, %s3811_s24  }
  0x15   : > { %3775 = sst [smem:[#allocation16_spill]] %s3089_s26  ;;  %s530_s28 = sshll.u32 %s3091_s27, 4  ;;  %s531_s28 = int_to_ptr.vmem [resolvable:$true] %s530_s28 }
  0x16   : > { %s3752_s29 = sadd.s32 4294967295, %s3089_s26   ;;  %p2504_p0 = scmp.ge.s32.totalorder %s3089_s26, 1 }
  0x17   : > { %p501_p1 = scmp.lt.s32.totalorder %s3089_s26, 3  ;;  %p3223_p2 = scmp.eq.s32.totalorder %s3752_s29, 0 }
  0x18   : > { %s40_s18 = sadd.s32 1, %s3085_s25  ;;  %s3092_s20 = smov [#allocation2]  }
  0x19   : > { %s3776_s0 = scalar_select %p3223_p2, 1, 0 }
  0x1a   : > { %p3227_p3 = pnand %p2504_p0, %p501_p1  ;;  %p3240_p6 = scmp.ge.s32.totalorder %s40_s18, 2 }
  0x1b   : > { %s516_s21 = sshll.u32 %s3092_s20, 4  ;;  %s3780_s27 = sld [smem:[#allocation19_spill]]  ;;  %s3244_s21 = int_to_ptr.vmem [resolvable:$true] %s516_s21 }
  0x1c   : > { %s3777_s30 = scalar_select %p3227_p3, 1, 0 }
  0x1d   : > { %p2792_p4 = pneg %p3227_p3 }
  0x1e   : > { %s3779_s1 = scalar_select %p3240_p6, 1, 0 }
  0x1f   : > { %p3236_p5 = pnand %p3223_p2, %p2792_p4 }
  0x21   : > { %s2913_s29 = scalar_lea.hbm %s3780_s27, 128  ;;  %p3254_p8 = pneg %p3236_p5 }
  0x22   : > { %p2914_p7 = scmp.ne.s32.totalorder %s3780_s27, %s2913_s29  ;;  %p2920_p11 = scmp.lt.u32.totalorder %s2913_s29, %s3780_s27 }
  0x24   : > { %p2916_p9 = pnand %p3254_p8, %p2914_p7 }
  0x26   : > { %p2917_p10 = pneg %p2916_p9 }
  0x28   : > { %p2922_p12 = pnand %p2920_p11, %p2917_p10 }
  0x2a   : > { %2925 = shalt.err (!%p2922_p12)
}
  0x2b   : > { %s2926_s22 = scalar_lea.vmem %s531_s28, 128  ;;  %p2934_p4 = scmp.lt.s32.totalorder %s531_s28, %s531_s28 }
  0x2c   : > { %p2927_p13 = scmp.ne.s32.totalorder %s531_s28, %s2926_s22  ;;  %p2935_p2 = scmp.lt.s32.totalorder %s2926_s22, %s2926_s22 }
  0x2e   : > { %p2929_p0 = pnand %p2927_p13, %p3254_p8  ;;  %p2936_p3 = por %p2935_p2, %p2934_p4 }
  0x30   : > { %p2930_p1 = pneg %p2929_p0 }
  0x32   : > { %p2937_p6 = pnand %p2936_p3, %p2930_p1 }
  0x34   : > { %2940 = shalt.err (!%p2937_p6)
}
  0x35   : > { %2798 = dma.hbm_to_vmem [thread:$0]  (!%p3236_p5), %s3780_s27, 128, %s531_s28, [#allocation6]  }
  0x36   : > { %p3782_p7 = scmp.ne.s32.totalorder %s3779_s1, 0  ;;  %s3784_s23 = sld [smem:[#allocation18_spill]] }
  0x38   : > { %s3814_s18 = smov (%p3782_p7, %s40_s18), 0 }
  0x39   : > { %3783 = sst [smem:[#allocation17_spill]] %s3814_s18 }
  0x3c   : > { %s2941_s20 = scalar_lea.hbm %s3784_s23, 256 }
  0x3d   : > { %p2942_p2 = scmp.ne.s32.totalorder %s3784_s23, %s2941_s20  ;;  %p2948_p9 = scmp.lt.u32.totalorder %s2941_s20, %s3784_s23 }
  0x3f   : > { %p2944_p3 = pnand %p2942_p2, %p3254_p8 }
  0x41   : > { %p2945_p6 = pneg %p2944_p3 }
  0x43   : > { %p2950_p10 = pnand %p2948_p9, %p2945_p6 }
  0x45   : > { %2953 = shalt.err (!%p2950_p10)
}
  0x46   : > { %s2954_s28 = scalar_lea.vmem %s3244_s21, 256  ;;  %p2962_p0 = scmp.lt.s32.totalorder %s3244_s21, %s3244_s21 }
  0x47   : > { %p2955_p11 = scmp.ne.s32.totalorder %s3244_s21, %s2954_s28  ;;  %p2963_p1 = scmp.lt.s32.totalorder %s2954_s28, %s2954_s28 }
  0x49   : > { %p2957_p12 = pnand %p2955_p11, %p3254_p8  ;;  %p2964_p4 = por %p2963_p1, %p2962_p0 }
  0x4b   : > { %p2958_p13 = pneg %p2957_p12 }
  0x4d   : > { %p2965_p7 = pnand %p2964_p4, %p2958_p13 }
  0x4f   : > { %2968 = shalt.err (!%p2965_p7)
}
  0x50   : > { %s3093_s16 = smov 128   ;;  %s3094_s14 = smov 8  }
  0x51   : > { %2795 = dma.hbm_to_vmem [thread:$0]  (!%p3236_p5), %s3784_s23, 256, %s3244_s21, [#allocation3], %s3093_s16, %s3093_s16, %s3094_s14  }
  0x52   : > { %s3095_s17 = smov [#allocation7]   ;;  %s3096_s2 = smov [#allocation8]  }
  0x53   : > { %s544_s25 = sshll.u32 %s3095_s17, 4  ;;  %s557_s29 = sshll.u32 %s3096_s2, 4  ;;  %s545_s25 = int_to_ptr.vmem [resolvable:$true] %s544_s25  ;;  %s558_s29 = int_to_ptr.vmem [resolvable:$true] %s557_s29 }
  0x54   : > { %s3785_s3 = sld [smem:[#allocation21_spill]] }
  0x5a   : > { %s2969_s28 = scalar_lea.hbm %s3785_s3, 16 }
  0x5b   : > { %p2970_p2 = scmp.ne.s32.totalorder %s3785_s3, %s2969_s28  ;;  %p2976_p9 = scmp.lt.u32.totalorder %s2969_s28, %s3785_s3 }
  0x5d   : > { %p2972_p3 = pnand %p2970_p2, %p3254_p8 }
  0x5f   : > { %p2973_p6 = pneg %p2972_p3 }
  0x61   : > { %p2978_p10 = pnand %p2976_p9, %p2973_p6 }
  0x63   : > { %2981 = shalt.err (!%p2978_p10)
}
  0x64   : > { %s2982_s21 = scalar_lea.vmem %s545_s25, 16  ;;  %s2989_s15 = scalar_lea.vmem %s545_s25, 32 }
  0x65   : > { %p2983_p11 = scmp.ne.s32.totalorder %s545_s25, %s2982_s21  ;;  %p2990_p0 = scmp.lt.s32.totalorder %s545_s25, %s545_s25 }
  0x66   : > { %p2991_p1 = scmp.lt.s32.totalorder %s2989_s15, %s2982_s21 }
  0x67   : > { %p2985_p12 = pnand %p2983_p11, %p3254_p8 }
  0x68   : > { %p2992_p4 = por %p2991_p1, %p2990_p0 }
  0x69   : > { %p2986_p13 = pneg %p2985_p12 }
  0x6b   : > { %p2993_p7 = pnand %p2992_p4, %p2986_p13 }
  0x6d   : > { %2996 = shalt.err (!%p2993_p7)
}
  0x6e   : > { %2801 = dma.hbm_to_vmem [thread:$0]  (!%p3236_p5), %s3785_s3, 16, %s545_s25, [#allocation6]  }
  0x6f   : > { %s3786_s4 = sld [smem:[#allocation22_spill]] }
  0x75   : > { %s2997_s1 = scalar_lea.hbm %s3786_s4, 256 }
  0x76   : > { %p2998_p2 = scmp.ne.s32.totalorder %s3786_s4, %s2997_s1  ;;  %p3004_p9 = scmp.lt.u32.totalorder %s2997_s1, %s3786_s4 }
  0x78   : > { %p3000_p3 = pnand %p2998_p2, %p3254_p8 }
  0x7a   : > { %p3001_p6 = pneg %p3000_p3 }
  0x7c   : > { %p3006_p10 = pnand %p3004_p9, %p3001_p6 }
  0x7e   : > { %3009 = shalt.err (!%p3006_p10)
}
  0x7f   : > { %s3010_s28 = scalar_lea.vmem %s558_s29, 256  ;;  %p3018_p0 = scmp.lt.s32.totalorder %s558_s29, %s558_s29 }
  0x80   : > { %p3011_p11 = scmp.ne.s32.totalorder %s558_s29, %s3010_s28  ;;  %p3019_p1 = scmp.lt.s32.totalorder %s3010_s28, %s3010_s28 }
  0x82   : > { %p3013_p12 = pnand %p3011_p11, %p3254_p8  ;;  %p3020_p4 = por %p3019_p1, %p3018_p0 }
  0x84   : > { %p3014_p13 = pneg %p3013_p12 }
  0x86   : > { %p3021_p7 = pnand %p3020_p4, %p3014_p13 }
  0x88   : > { %3024 = shalt.err (!%p3021_p7)
}
  0x89   : > { %2804 = dma.hbm_to_vmem [thread:$0]  (!%p3236_p5), %s3786_s4, 256, %s558_s29, [#allocation9], %s3093_s16, %s3093_s16, %s3094_s14  }
  0x8a   : > { %p3787_p2 = scmp.ne.s32.totalorder %s3777_s30, 0 }
  0x8b   : > { %p3788_p8 = scmp.ne.s32.totalorder (!%p3787_p2), %s3776_s0, 0 }
  0x8c   : > { %653 = sbr.rel (%p3787_p2) target bundleno = 4929 (0x1341), region = 88 }
  0x93   : > { %3064 = dma.done.wait (%p3788_p8), [#allocation3], 256  }
  0x94   : > { %3066 = vsyncadd (%p3788_p8), [#allocation3], 4294967040 }
  0x95   : > { %3068 = dma.done.wait (%p3788_p8), [#allocation6], 144  }
  0x96   : > { %3070 = vsyncadd (%p3788_p8), [#allocation6], 4294967152 }
  0x97   : > { %3072 = dma.done.wait (%p3788_p8), [#allocation9], 256  }
  0x98   : > { %3074 = vsyncadd (%p3788_p8), [#allocation9], 4294967040  ;;  %p753_p5 = scmp.lt.s32.totalorder %s3081_s24, 1  ;;  %s3789_s5 = sld [smem:[#allocation23_spill]] }
  0x99   : > { %s3790_s7 = sld [smem:[#allocation24_spill]]  ;;  %s3791_s11 = sld [smem:[#allocation25_spill]] }
  0x9a   : > { %s3355_s26 = scalar_select %p753_p5, %s3081_s24, 1 }
  0x9b   : > { %s3792_s27 = sld [smem:[#allocation26_spill]]  ;;  %s3793_s17 = sld [smem:[#allocation27_spill]] }
  0x9c   : > { %s2569_s30 = sshll.u32 %s3355_s26, 4  ;;  %s2572_s3 = sshll.u32 %s3355_s26, 5 }
  0x9d   : > { %s3794_s22 = sld [smem:[#allocation28_spill]]  ;;  %p2523_p3 = scmp.ne.s32.totalorder %s3081_s24, 0 }
  0x9e   : > { %s3365_s15 = scalar_lea.vmem %s3789_s5, %s2569_s30  ;;  %s3795_s5 = sld [smem:[#allocation29_spill]]  ;;  %v803_v0 = vld [vmem:[#allocation2] sm:$0xff] (!%p2523_p3)  ;;  %v805_v1 = vld [vmem:[#allocation5] sm:$0xff] (!%p2523_p3)  ;;  %vm810_vm0 = vcmask (!%p2523_p3), 261120   ;;  %v804_v2 = vld [vmem:[#allocation2 + $0x8] sm:$0xff] (!%p2523_p3) }
  0x9f   : > { %s3370_s12 = scalar_lea.vmem %s3790_s7, %s2569_s30  ;;  %s3387_s14 = scalar_lea.vmem %s3791_s11, %s2569_s30  ;;  %v806_v3 = vadd.f32 (!%p2523_p3), %v805_v1, %v803_v0  ;;  %v807_v4 = vadd.f32 (!%p2523_p3), %v805_v1, %v804_v2  ;;  %v2525_v26 = vld [vmem:[#allocation7] ss:$0 sm:$0xff] (!%p2523_p3) }
  0xa0   : > { %s3796_s7 = sld [smem:[#allocation30_spill]]  ;;  %802 = sbr.rel (%p2523_p3) target bundleno = 479 (0x1df), region = 108 }
  0xa1   : > { %s782_s0 = scalar_lea.vmem %s3792_s27, %s3355_s26  ;;  %s3397_s4 = scalar_lea.vmem %s3793_s17, %s2572_s3  ;;  %v811_v5 = vsel (!%p2523_p3), %vm810_vm0, %v806_v3, 0.0  ;;  %v814_v6 = vsel (!%p2523_p3), %vm810_vm0, %v807_v4, 0.0 }
  0xa2   : > { %812 = vadd.xlane.f32.xlu0 (!%p2523_p3), %v811_v5 }
  0xa3   : > { %s790_s28 = scalar_lea.vmem %s3794_s22, %s3355_s26 }
  0xa4   : > { %s793_s19 = scalar_lea.vmem %s3795_s5, %s3355_s26 }
  0xa6   : > { %s796_s11 = scalar_lea.vmem %s3796_s7, %s3355_s26  ;;  %815 = vadd.xlane.f32.xlu0 (!%p2523_p3), %v814_v6  ;;  %s3797_s7 = sld [smem:[#allocation20_spill]] (!%p2523_p3) }
  0xac   : > { %v2524_v24 = vld [vmem:[%s3797_s7] ss:$0 sm:$0xff] }
 0x12f   : > { %v813_v7 = vpop.xlane.xlu0 %812 }
 0x130   : > { %v818_v8 = vmul.f32 0.03125, %v813_v7 }
 0x132   : > { %v820_v9 = vsub.f32 %v806_v3, %v818_v8 }
 0x133   : > { %v816_v10 = vpop.xlane.xlu0 %815 }
 0x134   : > { %v819_v11 = vmul.f32 0.03125, %v816_v10  ;;  %v822_v12 = vmul.f32 %v820_v9, %v820_v9 }
 0x136   : > { %v821_v13 = vsub.f32 %v807_v4, %v819_v11  ;;  %v824_v14 = vsel %vm810_vm0, %v822_v12, 0.0 }
 0x137   : > { %825 = vadd.xlane.f32.xlu1 %v824_v14 }
 0x138   : > { %v823_v15 = vmul.f32 %v821_v13, %v821_v13 }
 0x13a   : > { %v827_v16 = vsel %vm810_vm0, %v823_v15, 0.0 }
 0x13b   : > { %828 = vadd.xlane.f32.xlu1 %v827_v16 }
 0x1c4   : > { %v826_v17 = vpop.xlane.xlu1 %825 }
 0x1c5   : > { %v830_v18 = vmul.f32 0.03125, %v826_v17 }
 0x1c7   : > { %v832_v19 = vadd.f32 1e-06, %v830_v18 }
 0x1c8   : > { %v829_v20 = vpop.xlane.xlu1 %828 }
 0x1c9   : > { %2861 = vrsqrt.f32 %v832_v19  ;;  %v831_v21 = vmul.f32 0.03125, %v829_v20 }
 0x1cb   : > { %v833_v22 = vadd.f32 1e-06, %v831_v21 }
 0x1cd   : > { %2863 = vrsqrt.f32 %v833_v22 }
 0x1d3   : > { %v2862_v23 = vpop.eup %2861 }
 0x1d4   : > { %v836_v25 = vmul.f32 %v2862_v23, %v820_v9 }
 0x1d6   : > { %v844_v27 = vmul.f32 %v2524_v24, %v836_v25 }
 0x1d7   : > { %v2864_v28 = vpop.eup %2863 }
 0x1d8   : > { %v852_v29 = vadd.f32 %v2525_v26, %v844_v27  ;;  %v837_v30 = vmul.f32 %v2864_v28, %v821_v13 }
 0x1da   : > { %854 = vst.msk [vmem:[#allocation10] sm:$0xff] %vm810_vm0, %v852_v29  ;;  %v845_v31 = vmul.f32 %v2524_v24, %v837_v30 }
 0x1dc   : > { %v853_v32 = vadd.f32 %v2525_v26, %v845_v31 }
 0x1de   : > { %855 = vst.msk [vmem:[#allocation10 + $0x8] sm:$0xff] %vm810_vm0, %v853_v32 }
 0x1df PF: > { %v2865_v33 = vld [vmem:[%s3365_s15] sm:$0xff]   ;;  %v3097_v34 = vmov 0.0   ;;  %v2866_v35 = vld [vmem:[%s3365_s15 + $0x8] sm:$0xff]   ;;  %vm3098_vm1 = vmmov 0   ;;  %vm882_vm2 = vcmask 261120   ;;  %s3798_s17 = scalar_lea.vmem %s3738_s6, %s3355_s26  ;;  %s3099_s22 = smov 96  }
 0x1e0   : > { %2624 = vmatprep.subr.bf16.mxu1 %v3097_v34  ;;  %2638 = vmatprep.subr.bf16.mxu0 %v3097_v34  ;;  %v2526_v39 = vld [vmem:[%s3798_s17] ss:$0 sm:$0xff]  ;;  %vm936_vm3 = vcmask 64512   ;;  %v3466_v56 = vld [vmem:[#allocation8 + $0x8] sm:$0xff]  ;;  %s3100_s21 = smov 64   ;;  %s3101_s29 = smov 88  }
 0x1e1   : > { %2625 = vmatpush3.bf16.msra.mxu1 %v2865_v33  ;;  %2628 = vmatprep.mubr.msk.bf16.mxu1 %vm3098_vm1, %v3097_v34  ;;  %v3427_v36 = vld [vmem:[#allocation10] sm:$0xff]  ;;  %v3463_v52 = vld [vmem:[#allocation8] sm:$0xff]  ;;  %vm930_vm5 = vcmp.eq.f32.partialorder %v3466_v56, 0.0  ;;  %vm1065_vm6 = vcmask 1043456   ;;  %s3102_s18 = smov 120   ;;  %s3103_s27 = smov 56  }
 0x1e2   : > { %2626 = vmatprep.subr.bf16.mxu1 %v3097_v34  ;;  %2640 = vmatprep.mubr.msk.bf16.mxu0 %vm3098_vm1, %v3097_v34  ;;  %vm929_vm4 = vcmp.eq.f32.partialorder %v3463_v52, 0.0  ;;  %s3104_s13 = smov 112   ;;  %s3105_s1 = smov 80   ;;  %vm2195_vm7 = vcmask 523264  }
 0x1e3   : > { %s3106_s2 = smov 48   ;;  %s3107_s20 = smov 72  }
 0x1e4   : > { %s3108_s25 = smov 104   ;;  %s3109_s30 = smov 40  }
 0x1e5   : > { %v3429_v37 = vld [vmem:[#allocation10 + $0x8] sm:$0xff]  ;;  %2627 = vmatpush3.bf16.msra.mxu1 %v2866_v35  ;;  %s3799_s3 = scalar_lea.vmem %s3740_s8, %s3355_s26  ;;  %s3800_s7 = scalar_lea.vmem %s3741_s9, %s3355_s26 }
 0x1e6   : > { %v858_v38 = vpack.c.bf16 %v3429_v37, %v3427_v36  ;;  %2632 = vmatprep.subr.bf16.mxu1 %v3097_v34  ;;  %s3801_s17 = scalar_lea.vmem %s3742_s10, %s3355_s26 }
 0x1e8   : > { %2629 = vmatmul.mubr.msk.bf16.vlgmr.msra.gmra.mrb[0].mxu1 %vm882_vm2, %v858_v38 }
 0x1e9   : > { %2634 = vmatprep.mubr.msk.bf16.mxu1 %vm3098_vm1, %v3097_v34 }
 0x2bb   : > { %v920_v40 = vpop.f32.mrb[0].mxu1 }
 0x2bc   : > { %v921_v41 = vadd.f32 %v2526_v39, %v920_v40  ;;  %v2630_v42 = vpop.f32.mrb[1].mxu1 }
 0x2bd   : > { %v923_v43 = vpop.f32.mrb[2].mxu1 }
 0x2be   : > { %v3445_v44 = vpack.c.bf16 %v921_v41, %v921_v41  ;;  %v924_v45 = vadd.f32 %v2526_v39, %v923_v43  ;;  %v2631_v46 = vpop.f32.mrb[3].mxu1 }
 0x2c0   : > { %934 = vrot.lane.b32.xlu0 %v3445_v44, %s3099_s22  ;;  %v3448_v47 = vpack.c.bf16 %v924_v45, %v924_v45 }
 0x2c4   : > { %984 = vrot.lane.b32.xlu0 %v3448_v47, %s3099_s22 }
 0x332   : > { %v935_v48 = vpop.permute.xlu0 %934 }
 0x333   : > { %v941_v49 = vsel %vm936_vm3, %v935_v48, 0 }
 0x334   : > { %2633 = vmatpush3.bf16.xpose.msra.mxu1 %v941_v49 }
 0x335   : > { %2644 = vmatprep.subr.bf16.mxu1 %v3097_v34 }
 0x336   : > { %v985_v50 = vpop.permute.xlu0 %984 }
 0x337   : > { %v990_v51 = vsel %vm936_vm3, %v985_v50, 0 }
 0x338   : > { %2639 = vmatpush3.bf16.xpose.msra.mxu0 %v990_v51 }
 0x339   : > { %2650 = vmatprep.subr.bf16.mxu0 %v3097_v34 }
 0x33b   : > { %2635 = vmatmul.mubr.msk.bf16.vlgmr.msra.gmra.mrb[4].mxu1 %vm936_vm3, %v3445_v44 }
 0x33c   : > { %2646 = vmatprep.mubr.msk.bf16.mxu1 %vm3098_vm1, %v3097_v34 }
 0x33f   : > { %2641 = vmatmul.mubr.msk.bf16.vlgmr.msra.gmra.mrb[0].mxu0 %vm936_vm3, %v3448_v47 }
 0x340   : > { %2652 = vmatprep.mubr.msk.bf16.mxu0 %vm3098_vm1, %v3097_v34 }
 0x40e   : > { %v977_v53 = vpop.f32.mrb[4].mxu1 }
 0x40f   : > { %v1032_v54 = vmul.f32 0.35355338, %v977_v53  ;;  %v2636_v55 = vpop.f32.mrb[5].mxu1 }
 0x410   : > { %v980_v57 = vpop.f32.mrb[6].mxu1 }
 0x411   : > { %v2637_v58 = vpop.f32.mrb[7].mxu1  ;;  %v1034_v59 = vsel %vm929_vm4, -1e+09, %v1032_v54 }
 0x412   : > { %v1026_v60 = vpop.f32.mrb[0].mxu0  ;;  %v1036_v61 = vsel %vm936_vm3, %v1034_v59, -inf }
 0x413   : > { %v1033_v62 = vmul.f32 0.35355338, %v1026_v60  ;;  %v2642_v63 = vpop.f32.mrb[1].mxu0  ;;  %1037 = vmax.xlane.f32.xlu1 %v1036_v61 }
 0x414   : > { %v1029_v0 = vpop.f32.mrb[2].mxu0 }
 0x415   : > { %v2643_v1 = vpop.f32.mrb[3].mxu0  ;;  %v1035_v2 = vsel %vm930_vm5, -1e+09, %v1033_v62 }
 0x416   : > { %v1039_v3 = vsel %vm936_vm3, %v1035_v2, -inf }
 0x417   : > { %1040 = vmax.xlane.f32.xlu1 %v1039_v3 }
 0x428   : > { %1060 = vrot.lane.b32.xlu1 %v3445_v44, %s3100_s21 }
 0x42c   : > { %1109 = vrot.lane.b32.xlu1 %v3448_v47, %s3100_s21 }
 0x430   : > { %1161 = vrot.lane.b32.xlu1 %v3445_v44, %s3101_s29 }
 0x4a0   : > { %v1038_v4 = vpop.xlane.xlu1 %1037 }
 0x4a1   : > { %v1042_v5 = vsub.f32 %v1034_v59, %v1038_v4 }
 0x4a3   : > { %v1044_v6 = vmul.f32 1.442695, %v1042_v5 }
 0x4a4   : > { %v1041_v7 = vpop.xlane.xlu1 %1040 }
 0x4a5   : > { %2873 = vpow2.f32 %v1044_v6  ;;  %v1043_v8 = vsub.f32 %v1035_v2, %v1041_v7 }
 0x4a7   : > { %v1046_v9 = vmul.f32 1.442695, %v1043_v8 }
 0x4a8   : > { %v1061_v10 = vpop.permute.xlu1 %1060 }
 0x4a9   : > { %2875 = vpow2.f32 %v1046_v9  ;;  %v1067_v11 = vsel %vm1065_vm6, %v1061_v10, 0 }
 0x4aa   : > { %2645 = vmatpush3.bf16.msra.mxu1 %v1067_v11 }
 0x4ab   : > { %2656 = vmatprep.subr.bf16.mxu1 %v3097_v34 }
 0x4ac   : > { %v1110_v12 = vpop.permute.xlu1 %1109 }
 0x4ad   : > { %v1115_v13 = vsel %vm1065_vm6, %v1110_v12, 0 }
 0x4ae   : > { %2651 = vmatpush3.bf16.msra.mxu0 %v1115_v13 }
 0x4af   : > { %v2874_v14 = vpop.eup %2873  ;;  %2662 = vmatprep.subr.bf16.mxu0 %v3097_v34 }
 0x4b0   : > { %v1048_v15 = vsel %vm936_vm3, %v2874_v14, 0.0  ;;  %v1162_v18 = vpop.permute.xlu1 %1161 }
 0x4b1   : > { %1049 = vadd.xlane.f32.xlu0 %v1048_v15  ;;  %v1167_v25 = vsel %vm936_vm3, %v1162_v18, 0  ;;  %v1384_v15 = vld [vmem:[%s3370_s12 + $0x4] sm:$0xf] }
 0x4b2   : > { %v1389_v18 = vsel %vm1065_vm6, %v1384_v15, 0 }
 0x4b3   : > { %v2876_v16 = vpop.eup %2875 }
 0x4b4   : > { %v1051_v17 = vsel %vm936_vm3, %v2876_v16, 0.0 }
 0x4b5   : > { %1052 = vadd.xlane.f32.xlu1 %v1051_v17 }
 0x4c6   : > { %1211 = vrot.lane.b32.xlu1 %v3448_v47, %s3101_s29 }
 0x4c7   : > { %1159 = vrot.lane.b32.xlu0 %v3445_v44, %s3102_s18 }
 0x4ca   : > { %1209 = vrot.lane.b32.xlu1 %v3448_v47, %s3102_s18 }
 0x53e   : > { %v1050_v19 = vpop.xlane.xlu0 %1049 }
 0x53f   : > { %2877 = vrcp.f32 %v1050_v19 }
 0x542   : > { %v1053_v20 = vpop.xlane.xlu1 %1052  ;;  %v1160_v30 = vpop.permute.xlu0 %1159 }
 0x543   : > { %2879 = vrcp.f32 %v1053_v20  ;;  %v1158_v20 = vld [vmem:[%s3370_s12] sm:$0xf] }
 0x546   : > { %v1212_v27 = vpop.permute.xlu1 %1211 }
 0x547   : > { %v1217_v29 = vsel %vm936_vm3, %v1212_v27, 0 }
 0x549   : > { %v2878_v21 = vpop.eup %2877 }
 0x54a   : > { %v1056_v22 = vmul.f32 %v2878_v21, %v2874_v14  ;;  %v1210_v31 = vpop.permute.xlu1 %1209 }
 0x54c   : > { %v1058_v23 = vpack.c.bf16 %v1056_v22, %v1056_v22 }
 0x54d   : > { %v2880_v24 = vpop.eup %2879 }
 0x54e   : > { %v1057_v26 = vmul.f32 %v2880_v24, %v2876_v16  ;;  %2647 = vmatmul.mubr.msk.bf16.vlgmr.msra.gmra.mrb[8].mxu1 %vm936_vm3, %v1058_v23  ;;  %v1436_v23 = vsel %vm1065_vm6, %v1158_v20, 0 }
 0x54f   : > { %2657 = vmatpush3.bf16.xpose.msra.mxu1 %v1167_v25  ;;  %2658 = vmatprep.mubr.msk.bf16.mxu1 %vm3098_vm1, %v3097_v34 }
 0x550   : > { %v1059_v28 = vpack.c.bf16 %v1057_v26, %v1057_v26  ;;  %2668 = vmatprep.subr.bf16.mxu1 %v3097_v34 }
 0x552   : > { %2653 = vmatmul.mubr.msk.bf16.vlgmr.msra.gmra.mrb[4].mxu0 %vm936_vm3, %v1059_v28 }
 0x553   : > { %2663 = vmatpush3.bf16.xpose.msra.mxu0 %v1217_v29  ;;  %2664 = vmatprep.mubr.msk.bf16.mxu0 %vm3098_vm1, %v3097_v34 }
 0x554   : > { %2674 = vmatprep.subr.bf16.mxu0 %v3097_v34 }
 0x556   : > { %2659 = vmatmul.mubr.msk.bf16.vlgmr.msra.gmra.mrb[12].mxu1 %vm936_vm3, %v1160_v30 }
 0x557   : > { %2670 = vmatprep.mubr.msk.bf16.mxu1 %vm3098_vm1, %v3097_v34 }
 0x55a   : > { %2665 = vmatmul.mubr.msk.bf16.vlgmr.msra.gmra.mrb[8].mxu0 %vm936_vm3, %v1210_v31 }
 0x55b   : > { %2676 = vmatprep.mubr.msk.bf16.mxu0 %vm3098_vm1, %v3097_v34 }
 0x621   : > { %v3503_v32 = vpop.f32.mrb[8].mxu1 }
 0x622   : > { %v2648_v33 = vpop.f32.mrb[9].mxu1 }
 0x623   : > { %v1106_v35 = vpop.f32.mrb[10].mxu1 }
 0x624   : > { %v2649_v38 = vpop.f32.mrb[11].mxu1 }
 0x625   : > { %v3505_v39 = vpop.f32.mrb[4].mxu0 }
 0x626   : > { %v1157_v40 = vpack.c.bf16 %v3505_v39, %v3503_v32  ;;  %v2654_v41 = vpop.f32.mrb[5].mxu0 }
 0x627   : > { %v1154_v42 = vpop.f32.mrb[6].mxu0 }
 0x628   : > { %v2655_v43 = vpop.f32.mrb[7].mxu0 }
 0x629   : > { %v1203_v45 = vpop.f32.mrb[12].mxu1 }
 0x62a   : > { %v1259_v46 = vmul.f32 0.35355338, %v1203_v45  ;;  %v2660_v48 = vpop.f32.mrb[13].mxu1 }
 0x62b   : > { %v1206_v49 = vpop.f32.mrb[14].mxu1 }
 0x62c   : > { %v2661_v50 = vpop.f32.mrb[15].mxu1  ;;  %v1261_v51 = vsel %vm929_vm4, -1e+09, %v1259_v46 }
 0x62d   : > { %v1253_v53 = vpop.f32.mrb[8].mxu0  ;;  %v1263_v54 = vsel %vm936_vm3, %v1261_v51, -inf }
 0x62e   : > { %v1260_v55 = vmul.f32 0.35355338, %v1253_v53  ;;  %v2666_v57 = vpop.f32.mrb[9].mxu0  ;;  %1264 = vmax.xlane.f32.xlu1 %v1263_v54 }
 0x62f   : > { %v1256_v58 = vpop.f32.mrb[10].mxu0 }
 0x630   : > { %v2667_v59 = vpop.f32.mrb[11].mxu0  ;;  %v1262_v60 = vsel %vm930_vm5, -1e+09, %v1260_v55 }
 0x631   : > { %v1266_v61 = vsel %vm936_vm3, %v1262_v60, -inf }
 0x632   : > { %1267 = vmax.xlane.f32.xlu0 %v1266_v61 }
 0x648   : > { %1335 = vrot.lane.b32.xlu0 %v3448_v47, %s3103_s27 }
 0x64c   : > { %1479 = vrot.lane.b32.xlu0 %v3445_v44, %s3104_s13 }
 0x6bb   : > { %v1265_v62 = vpop.xlane.xlu1 %1264 }
 0x6bc   : > { %v1269_v63 = vsub.f32 %v1261_v51, %v1265_v62 }
 0x6be   : > { %v1271_v0 = vmul.f32 1.442695, %v1269_v63 }
 0x6bf   : > { %v1268_v1 = vpop.xlane.xlu0 %1267 }
 0x6c0   : > { %2881 = vpow2.f32 %v1271_v0  ;;  %v1270_v2 = vsub.f32 %v1262_v60, %v1268_v1 }
 0x6c2   : > { %v1273_v3 = vmul.f32 1.442695, %v1270_v2 }
 0x6c3   : > { %v1336_v4 = vpop.permute.xlu0 %1335 }
 0x6c4   : > { %2883 = vpow2.f32 %v1273_v3  ;;  %v1341_v5 = vsel %vm1065_vm6, %v1336_v4, 0 }
 0x6c5   : > { %2675 = vmatpush3.bf16.msra.mxu0 %v1341_v5 }
 0x6c6   : > { %2686 = vmatprep.subr.bf16.mxu0 %v3097_v34 }
 0x6c7   : > { %v1480_v43 = vpop.permute.xlu0 %1479 }
 0x6ca   : > { %v2882_v6 = vpop.eup %2881 }
 0x6cb   : > { %v1275_v7 = vsel %vm936_vm3, %v2882_v6, 0.0 }
 0x6cc   : > { %1276 = vadd.xlane.f32.xlu1 %v1275_v7 }
 0x6ce   : > { %v2884_v8 = vpop.eup %2883 }
 0x6cf   : > { %v1278_v9 = vsel %vm936_vm3, %v2884_v8, 0.0 }
 0x6d0   : > { %1279 = vadd.xlane.f32.xlu1 %v1278_v9 }
 0x6e1   : > { %1287 = vrot.lane.b32.xlu1 %v3445_v44, %s3103_s27 }
 0x6e5   : > { %1481 = vrot.lane.b32.xlu1 %v3445_v44, %s3105_s1 }
 0x6e9   : > { %1531 = vrot.lane.b32.xlu1 %v3448_v47, %s3105_s1 }
 0x6ed   : > { %1529 = vrot.lane.b32.xlu1 %v3448_v47, %s3104_s13 }
 0x759   : > { %v1277_v10 = vpop.xlane.xlu1 %1276 }
 0x75a   : > { %2885 = vrcp.f32 %v1277_v10 }
 0x75d   : > { %v1280_v11 = vpop.xlane.xlu1 %1279 }
 0x75e   : > { %2887 = vrcp.f32 %v1280_v11 }
 0x761   : > { %v1288_v12 = vpop.permute.xlu1 %1287 }
 0x762   : > { %v1293_v13 = vsel %vm1065_vm6, %v1288_v12, 0 }
 0x763   : > { %2669 = vmatpush3.bf16.msra.mxu1 %v1293_v13 }
 0x764   : > { %v2886_v14 = vpop.eup %2885  ;;  %2680 = vmatprep.subr.bf16.mxu1 %v3097_v34 }
 0x765   : > { %v1283_v16 = vmul.f32 %v2886_v14, %v2882_v6  ;;  %v1482_v24 = vpop.permute.xlu1 %1481 }
 0x766   : > { %v1487_v39 = vsel %vm936_vm3, %v1482_v24, 0 }
 0x767   : > { %v1285_v17 = vpack.c.bf16 %v1283_v16, %v1283_v16 }
 0x768   : > { %v2888_v19 = vpop.eup %2887 }
 0x769   : > { %v1284_v21 = vmul.f32 %v2888_v19, %v2884_v8  ;;  %2671 = vmatmul.mubr.msk.bf16.vlgmr.msra.gmra.mrb[16].mxu1 %vm936_vm3, %v1285_v17  ;;  %v1532_v25 = vpop.permute.xlu1 %1531 }
 0x76a   : > { %2681 = vmatpush3.bf16.msra.mxu1 %v1389_v18  ;;  %2682 = vmatprep.mubr.msk.bf16.mxu1 %vm3098_vm1, %v3097_v34  ;;  %v1537_v26 = vsel %vm936_vm3, %v1532_v25, 0 }
 0x76b   : > { %v1286_v22 = vpack.c.bf16 %v1284_v21, %v1284_v21  ;;  %2692 = vmatprep.subr.bf16.mxu1 %v3097_v34 }
 0x76d   : > { %2677 = vmatmul.mubr.msk.bf16.vlgmr.msra.gmra.mrb[12].mxu0 %vm936_vm3, %v1286_v22  ;;  %v1530_v27 = vpop.permute.xlu1 %1529 }
 0x76e   : > { %2687 = vmatpush3.bf16.msra.mxu0 %v1436_v23  ;;  %2688 = vmatprep.mubr.msk.bf16.mxu0 %vm3098_vm1, %v3097_v34 }
 0x76f   : > { %2698 = vmatprep.subr.bf16.mxu0 %v3097_v34 }
 0x775   : > { %2689 = vmatmul.mubr.msk.bf16.vlgmr.msra.gmra.mrb[16].mxu0 %vm936_vm3, %v1157_v40 }
 0x776   : > { %2700 = vmatprep.mubr.msk.bf16.mxu0 %vm3098_vm1, %v3097_v34 }
 0x777   : > { %2699 = vmatpush3.bf16.xpose.msra.mxu0 %v1537_v26 }
 0x778   : > { %2710 = vmatprep.subr.bf16.mxu0 %v3097_v34 }
 0x77e   : > { %2701 = vmatmul.mubr.msk.bf16.vlgmr.msra.gmra.mrb[20].mxu0 %vm936_vm3, %v1530_v27 }
 0x77f   : > { %2712 = vmatprep.mubr.msk.bf16.mxu0 %vm3098_vm1, %v3097_v34 }
 0x83c   : > { %v1329_v28 = vpop.f32.mrb[16].mxu1 }
 0x83d   : > { %v2672_v29 = vpop.f32.mrb[17].mxu1 }
 0x83e   : > { %v1332_v30 = vpop.f32.mrb[18].mxu1 }
 0x83f   : > { %v2673_v31 = vpop.f32.mrb[19].mxu1 }
 0x840   : > { %v1377_v32 = vpop.f32.mrb[12].mxu0  ;;  %v1704_v31 = vld [vmem:[%s3370_s12 + $0x8] sm:$0xf] }
 0x841   : > { %v1383_v33 = vpack.c.bf16 %v1377_v32, %v1329_v28  ;;  %v2678_v35 = vpop.f32.mrb[13].mxu0  ;;  %v1709_v32 = vsel %vm1065_vm6, %v1704_v31, 0 }
 0x842   : > { %v1380_v38 = vpop.f32.mrb[14].mxu0 }
 0x843   : > { %v2679_v40 = vpop.f32.mrb[15].mxu0  ;;  %2683 = vmatmul.mubr.msk.bf16.vlgmr.msra.gmra.mrb[20].mxu1 %vm936_vm3, %v1383_v33 }
 0x844   : > { %2693 = vmatpush3.bf16.xpose.msra.mxu1 %v1487_v39  ;;  %2694 = vmatprep.mubr.msk.bf16.mxu1 %vm3098_vm1, %v3097_v34 }
 0x845   : > { %2704 = vmatprep.subr.bf16.mxu1 %v3097_v34 }
 0x848   : > { %v1472_v41 = vpop.f32.mrb[16].mxu0 }
 0x849   : > { %v2690_v42 = vpop.f32.mrb[17].mxu0 }
 0x84a   : > { %v1475_v45 = vpop.f32.mrb[18].mxu0 }
 0x84b   : > { %v2691_v46 = vpop.f32.mrb[19].mxu0  ;;  %2695 = vmatmul.mubr.msk.bf16.vlgmr.msra.gmra.mrb[24].mxu1 %vm936_vm3, %v1480_v43 }
 0x84c   : > { %2706 = vmatprep.mubr.msk.bf16.mxu1 %vm3098_vm1, %v3097_v34 }
 0x851   : > { %v1573_v48 = vpop.f32.mrb[20].mxu0 }
 0x852   : > { %v1580_v49 = vmul.f32 0.35355338, %v1573_v48  ;;  %v2702_v50 = vpop.f32.mrb[21].mxu0 }
 0x853   : > { %v1576_v51 = vpop.f32.mrb[22].mxu0 }
 0x854   : > { %v2703_v53 = vpop.f32.mrb[23].mxu0  ;;  %v1582_v54 = vsel %vm930_vm5, -1e+09, %v1580_v49 }
 0x855   : > { %v1586_v55 = vsel %vm936_vm3, %v1582_v54, -inf }
 0x856   : > { %1587 = vmax.xlane.f32.xlu1 %v1586_v55 }
 0x867   : > { %1607 = vrot.lane.b32.xlu1 %v3445_v44, %s3106_s2 }
 0x86b   : > { %1756 = vrot.lane.b32.xlu1 %v3445_v44, %s3107_s20 }
 0x86f   : > { %1806 = vrot.lane.b32.xlu1 %v3448_v47, %s3107_s20 }
 0x873   : > { %1804 = vrot.lane.b32.xlu1 %v3448_v47, %s3108_s25 }
 0x8e3   : > { %v1588_v57 = vpop.xlane.xlu1 %1587 }
 0x8e4   : > { %v1590_v60 = vsub.f32 %v1582_v54, %v1588_v57 }
 0x8e6   : > { %v1593_v61 = vmul.f32 1.442695, %v1590_v60 }
 0x8e7   : > { %v1608_v58 = vpop.permute.xlu1 %1607 }
 0x8e8   : > { %v1613_v59 = vsel %vm1065_vm6, %v1608_v58, 0  ;;  %2889 = vpow2.f32 %v1593_v61 }
 0x8e9   : > { %2705 = vmatpush3.bf16.msra.mxu1 %v1613_v59 }
 0x8ea   : > { %2716 = vmatprep.subr.bf16.mxu1 %v3097_v34 }
 0x8eb   : > { %v1757_v26 = vpop.permute.xlu1 %1756 }
 0x8ec   : > { %v1762_v28 = vsel %vm936_vm3, %v1757_v26, 0 }
 0x8ef   : > { %v1807_v40 = vpop.permute.xlu1 %1806 }
 0x8f0   : > { %v1812_v46 = vsel %vm936_vm3, %v1807_v40, 0 }
 0x8f2   : > { %v2890_v11 = vpop.eup %2889 }
 0x8f3   : > { %v1598_v12 = vsel %vm936_vm3, %v2890_v11, 0.0  ;;  %v1805_v57 = vpop.permute.xlu1 %1804 }
 0x916   : > { %v1425_v62 = vpop.f32.mrb[20].mxu1 }
 0x917   : > { %v3569_v63 = vadd.f32 %v1472_v41, %v1425_v62  ;;  %v2684_v0 = vpop.f32.mrb[21].mxu1 }
 0x918   : > { %v1428_v1 = vpop.f32.mrb[22].mxu1 }
 0x919   : > { %v3571_v2 = vadd.f32 %v1475_v45, %v1428_v1  ;;  %v2685_v3 = vpop.f32.mrb[23].mxu1 }
 0x91e   : > { %v1523_v4 = vpop.f32.mrb[24].mxu1 }
 0x91f   : > { %v1579_v5 = vmul.f32 0.35355338, %v1523_v4  ;;  %v2696_v6 = vpop.f32.mrb[25].mxu1 }
 0x920   : > { %v1526_v7 = vpop.f32.mrb[26].mxu1 }
 0x921   : > { %v2697_v8 = vpop.f32.mrb[27].mxu1  ;;  %v1581_v9 = vsel %vm929_vm4, -1e+09, %v1579_v5 }
 0x922   : > { %v1583_v10 = vsel %vm936_vm3, %v1581_v9, -inf }
 0x923   : > { %1584 = vmax.xlane.f32.xlu0 %v1583_v10 }
 0x927   : > { %1599 = vadd.xlane.f32.xlu0 %v1598_v12 }
 0x9b0   : > { %v1585_v13 = vpop.xlane.xlu0 %1584 }
 0x9b1   : > { %v1589_v14 = vsub.f32 %v1581_v9, %v1585_v13 }
 0x9b3   : > { %v1591_v15 = vmul.f32 1.442695, %v1589_v14 }
 0x9b4   : > { %v1600_v18 = vpop.xlane.xlu0 %1599 }
 0x9b5   : > { %2891 = vpow2.f32 %v1591_v15 }
 0x9b6   : > { %2893 = vrcp.f32 %v1600_v18 }
 0x9bf   : > { %v2892_v16 = vpop.eup %2891 }
 0x9c0   : > { %v1595_v17 = vsel %vm936_vm3, %v2892_v16, 0.0  ;;  %v2894_v19 = vpop.eup %2893 }
 0x9c1   : > { %1596 = vadd.xlane.f32.xlu0 %v1595_v17  ;;  %v1604_v21 = vmul.f32 %v2894_v19, %v2890_v11 }
 0x9c3   : > { %v1606_v24 = vpack.c.bf16 %v1604_v21, %v1604_v21  ;;  %v1979_v21 = vld [vmem:[%s3370_s12 + $0xc] sm:$0xf] }
 0x9d7   : > { %1655 = vrot.lane.b32.xlu0 %v3448_v47, %s3106_s2 }
 0x9db   : > { %1754 = vrot.lane.b32.xlu0 %v3445_v44, %s3108_s25 }
 0xa4e   : > { %v1597_v20 = vpop.xlane.xlu0 %1596 }
 0xa4f   : > { %2895 = vrcp.f32 %v1597_v20 }
 0xa52   : > { %v1656_v22 = vpop.permute.xlu0 %1655 }
 0xa53   : > { %v1661_v23 = vsel %vm1065_vm6, %v1656_v22, 0  ;;  %v1984_v22 = vsel %vm1065_vm6, %v1979_v21, 0  ;;  %v2553_v21 = vld [vmem:[%s782_s0] ss:$0 sm:$0xff]  ;;  %s3804_s0 = sld [smem:[#allocation16_spill]] }
 0xa54   : > { %2711 = vmatpush3.bf16.msra.mxu0 %v1661_v23 }
 0xa55   : > { %2722 = vmatprep.subr.bf16.mxu0 %v3097_v34 }
 0xa56   : > { %v1755_v30 = vpop.permute.xlu0 %1754 }
 0xa57   : > { %2713 = vmatmul.mubr.msk.bf16.vlgmr.msra.gmra.mrb[24].mxu0 %vm936_vm3, %v1606_v24 }
 0xa58   : > { %2724 = vmatprep.mubr.msk.bf16.mxu0 %vm3098_vm1, %v3097_v34 }
 0xa59   : > { %v2896_v25 = vpop.eup %2895  ;;  %s3807_s16 = sadd.s32 4294967295, %s3804_s0  }
 0xa5a   : > { %v1603_v27 = vmul.f32 %v2896_v25, %v2892_v16  ;;  %p3695_p6 = scmp.eq.s32.totalorder %s3807_s16, 1 }
 0xa5c   : > { %v1605_v29 = vpack.c.bf16 %v1603_v27, %v1603_v27 }
 0xa5d   : > { %2723 = vmatpush3.bf16.xpose.msra.mxu0 %v1762_v28 }
 0xa5e   : > { %2707 = vmatmul.mubr.msk.bf16.vlgmr.msra.gmra.mrb[28].mxu1 %vm936_vm3, %v1605_v29  ;;  %2734 = vmatprep.subr.bf16.mxu0 %v3097_v34 }
 0xa5f   : > { %2718 = vmatprep.mubr.msk.bf16.mxu1 %vm3098_vm1, %v3097_v34  ;;  %2717 = vmatpush3.bf16.msra.mxu1 %v1709_v32 }
 0xa60   : > { %2728 = vmatprep.subr.bf16.mxu1 %v3097_v34 }
 0xa64   : > { %2725 = vmatmul.mubr.msk.bf16.vlgmr.msra.gmra.mrb[28].mxu0 %vm936_vm3, %v1755_v30 }
 0xa65   : > { %2736 = vmatprep.mubr.msk.bf16.mxu0 %vm3098_vm1, %v3097_v34 }
 0xb2a   : > { %v1697_v33 = vpop.f32.mrb[24].mxu0 }
 0xb2b   : > { %v2714_v35 = vpop.f32.mrb[25].mxu0 }
 0xb2c   : > { %v1700_v38 = vpop.f32.mrb[26].mxu0 }
 0xb2d   : > { %v2715_v39 = vpop.f32.mrb[27].mxu0 }
 0xb31   : > { %v1649_v41 = vpop.f32.mrb[28].mxu1 }
 0xb32   : > { %v1703_v42 = vpack.c.bf16 %v1697_v33, %v1649_v41  ;;  %v2708_v43 = vpop.f32.mrb[29].mxu1  ;;  %v2550_v41 = vld [vmem:[%s3799_s3] ss:$0 sm:$0xff] }
 0xb33   : > { %v1652_v45 = vpop.f32.mrb[30].mxu1 }
 0xb34   : > { %v2709_v48 = vpop.f32.mrb[31].mxu1  ;;  %2719 = vmatmul.mubr.msk.bf16.vlgmr.msra.gmra.mrb[32].mxu1 %vm936_vm3, %v1703_v42 }
 0xb35   : > { %2729 = vmatpush3.bf16.xpose.msra.mxu1 %v1812_v46  ;;  %2730 = vmatprep.mubr.msk.bf16.mxu1 %vm3098_vm1, %v3097_v34 }
 0xb36   : > { %2740 = vmatprep.subr.bf16.mxu1 %v3097_v34 }
 0xb37   : > { %v1798_v49 = vpop.f32.mrb[28].mxu0 }
 0xb38   : > { %v1854_v50 = vmul.f32 0.35355338, %v1798_v49  ;;  %v2726_v51 = vpop.f32.mrb[29].mxu0 }
 0xb39   : > { %v1801_v53 = vpop.f32.mrb[30].mxu0 }
 0xb3a   : > { %v2727_v54 = vpop.f32.mrb[31].mxu0  ;;  %v1856_v55 = vsel %vm929_vm4, -1e+09, %v1854_v50 }
 0xb3b   : > { %v1858_v58 = vsel %vm936_vm3, %v1856_v55, -inf }
 0xb3c   : > { %1859 = vmax.xlane.f32.xlu0 %v1858_v58  ;;  %2731 = vmatmul.mubr.msk.bf16.vlgmr.msra.gmra.mrb[36].mxu1 %vm936_vm3, %v1805_v57 }
 0xb3d   : > { %2742 = vmatprep.mubr.msk.bf16.mxu1 %vm3098_vm1, %v3097_v34 }
 0xbc9   : > { %v1860_v59 = vpop.xlane.xlu0 %1859 }
 0xbca   : > { %v1864_v60 = vsub.f32 %v1856_v55, %v1860_v59 }
 0xbcc   : > { %v1866_v61 = vmul.f32 1.442695, %v1864_v60 }
 0xbce   : > { %2897 = vpow2.f32 %v1866_v61 }
 0xbd8   : > { %v2898_v62 = vpop.eup %2897 }
 0xbd9   : > { %v1870_v0 = vsel %vm936_vm3, %v2898_v62, 0.0 }
 0xbda   : > { %1871 = vadd.xlane.f32.xlu0 %v1870_v0 }
 0xc07   : > { %v1745_v1 = vpop.f32.mrb[32].mxu1 }
 0xc08   : > { %v1752_v52 = vadd.f32 %v1745_v1, %v3569_v63  ;;  %v2720_v3 = vpop.f32.mrb[33].mxu1 }
 0xc09   : > { %v1748_v4 = vpop.f32.mrb[34].mxu1  ;;  %v2868_v3 = vld [vmem:[%s3387_s14 + $0x8] sm:$0xff]  }
 0xc0a   : > { %v3612_v5 = vadd.f32 %v1748_v4, %v3571_v2  ;;  %v2721_v6 = vpop.f32.mrb[35].mxu1  ;;  %v2869_v4 = vld [vmem:[%s3397_s4] sm:$0xff]  }
 0xc0f   : > { %v1848_v7 = vpop.f32.mrb[36].mxu1 }
 0xc10   : > { %v1855_v8 = vmul.f32 0.35355338, %v1848_v7  ;;  %v2732_v9 = vpop.f32.mrb[37].mxu1 }
 0xc11   : > { %v1851_v10 = vpop.f32.mrb[38].mxu1 }
 0xc12   : > { %v2733_v11 = vpop.f32.mrb[39].mxu1  ;;  %v1857_v12 = vsel %vm930_vm5, -1e+09, %v1855_v8 }
 0xc13   : > { %v1861_v13 = vsel %vm936_vm3, %v1857_v12, -inf }
 0xc14   : > { %1862 = vmax.xlane.f32.xlu1 %v1861_v13  ;;  %v2551_v13 = vld [vmem:[%s3800_s7] ss:$0 sm:$0xff] }
 0xc25   : > { %1882 = vrot.lane.b32.xlu1 %v3445_v44, %s3109_s30 }
 0xc67   : > { %v1872_v63 = vpop.xlane.xlu0 %1871 }
 0xc68   : > { %2899 = vrcp.f32 %v1872_v63 }
 0xc72   : > { %v2900_v14 = vpop.eup %2899 }
 0xc73   : > { %v1878_v16 = vmul.f32 %v2900_v14, %v2898_v62 }
 0xc75   : > { %v1880_v56 = vpack.c.bf16 %v1878_v16, %v1878_v16  ;;  %v2552_v16 = vld [vmem:[%s3801_s17] ss:$0 sm:$0xff] }
 0xca1   : > { %v1863_v2 = vpop.xlane.xlu1 %1862 }
 0xca2   : > { %v1865_v15 = vsub.f32 %v1857_v12, %v1863_v2 }
 0xca4   : > { %v1868_v17 = vmul.f32 1.442695, %v1865_v15 }
 0xca5   : > { %v1883_v18 = vpop.permute.xlu1 %1882 }
 0xca6   : > { %2901 = vpow2.f32 %v1868_v17  ;;  %v1888_v19 = vsel %vm1065_vm6, %v1883_v18, 0 }
 0xca7   : > { %2735 = vmatpush3.bf16.msra.mxu0 %v1888_v19 }
 0xca8   : > { %2746 = vmatprep.subr.bf16.mxu0 %v3097_v34 }
 0xcaa   : > { %2737 = vmatmul.mubr.msk.bf16.vlgmr.msra.gmra.mrb[32].mxu0 %vm936_vm3, %v1880_v56 }
 0xcab   : > { %2748 = vmatprep.mubr.msk.bf16.mxu0 %vm3098_vm1, %v3097_v34  ;;  %2747 = vmatpush3.bf16.msra.mxu0 %v1984_v22 }
 0xcac   : > { %2760 = vmatprep.subr.bf16.mxu0 %v3097_v34 }
 0xcb0   : > { %v2902_v44 = vpop.eup %2901 }
 0xcb1   : > { %v1873_v20 = vsel %vm936_vm3, %v2902_v44, 0.0 }
 0xcb2   : > { %1874 = vadd.xlane.f32.xlu0 %v1873_v20  ;;  %v2872_v20 = vld [vmem:[%s3397_s4 + $0x18] sm:$0xff]  }
 0xcc8   : > { %1930 = vrot.lane.b32.xlu0 %v3448_v47, %s3109_s30  ;;  %s3110_s30 = smov [#allocation10]  }
 0xcc9   : > { %s2297_s12 = sshll.u32 %s3110_s30, 4  ;;  %s2298_s12 = int_to_ptr.vmem [resolvable:$true] %s2297_s12 }
 0xcca   : > { %s3025_s26 = scalar_lea.vmem %s2298_s12, 256  ;;  %p3032_p12 = scmp.lt.s32.totalorder %s2298_s12, %s2298_s12 }
 0xccb   : > { %p3026_p9 = scmp.ne.s32.totalorder %s2298_s12, %s3025_s26  ;;  %p3033_p13 = scmp.lt.s32.totalorder %s3025_s26, %s3025_s26 }
 0xccd   : > { %p3027_p10 = pnand %p3026_p9, %p3695_p6  ;;  %p3034_p0 = por %p3033_p13, %p3032_p12 }
 0xccf   : > { %p3028_p11 = pneg %p3027_p10 }
 0xcd1   : > { %p3035_p1 = pnand %p3034_p0, %p3028_p11 }
 0xd3f   : > { %v1875_v23 = vpop.xlane.xlu0 %1874 }
 0xd40   : > { %2903 = vrcp.f32 %v1875_v23 }
 0xd43   : > { %v1931_v24 = vpop.permute.xlu0 %1930 }
 0xd44   : > { %v1936_v25 = vsel %vm1065_vm6, %v1931_v24, 0 }
 0xd45   : > { %2741 = vmatpush3.bf16.msra.mxu1 %v1936_v25 }
 0xd46   : > { %2752 = vmatprep.subr.bf16.mxu1 %v3097_v34 }
 0xd4a   : > { %v2904_v26 = vpop.eup %2903 }
 0xd4b   : > { %v1879_v27 = vmul.f32 %v2904_v26, %v2902_v44  ;;  %v2871_v44 = vld [vmem:[%s3397_s4 + $0x10] sm:$0xff]  }
 0xd4d   : > { %v1881_v28 = vpack.c.bf16 %v1879_v27, %v1879_v27 }
 0xd4f   : > { %2743 = vmatmul.mubr.msk.bf16.vlgmr.msra.gmra.mrb[40].mxu1 %vm936_vm3, %v1881_v28 }
 0xd50   : > { %2756 = vmatprep.mubr.msk.bf16.mxu1 %vm3098_vm1, %v3097_v34 }
 0xd7d   : > { %v1924_v47 = vpop.f32.mrb[32].mxu0 }
 0xd7e   : > { %v2738_v29 = vpop.f32.mrb[33].mxu0 }
 0xd7f   : > { %v1927_v30 = vpop.f32.mrb[34].mxu0 }
 0xd80   : > { %v2739_v31 = vpop.f32.mrb[35].mxu0 }
 0xe22   : > { %v1972_v32 = vpop.f32.mrb[40].mxu1 }
 0xe23   : > { %v1978_v33 = vpack.c.bf16 %v1972_v32, %v1924_v47  ;;  %v2744_v35 = vpop.f32.mrb[41].mxu1 }
 0xe24   : > { %v1975_v38 = vpop.f32.mrb[42].mxu1 }
 0xe25   : > { %v2745_v39 = vpop.f32.mrb[43].mxu1  ;;  %2749 = vmatmul.mubr.msk.bf16.vlgmr.msra.gmra.mrb[36].mxu0 %vm936_vm3, %v1978_v33 }
 0xe26   : > { %2768 = vmatprep.mubr.msk.bf16.mxu0 %vm3098_vm1, %v3097_v34  ;;  %2761 = vmatpush3.bf16.msra.mxu0 %v2869_v4 }
 0xe27   : > { %2762 = vmatprep.subr.bf16.mxu0 %v3097_v34 }
 0xef8   : > { %v2020_v40 = vpop.f32.mrb[36].mxu0 }
 0xef9   : > { %v2027_v42 = vadd.f32 %v2020_v40, %v1752_v52  ;;  %v2750_v43 = vpop.f32.mrb[37].mxu0  ;;  %v2867_v52 = vld [vmem:[%s3387_s14] sm:$0xff]  }
 0xefa   : > { %v2023_v45 = vpop.f32.mrb[38].mxu0  ;;  %2753 = vmatpush3.bf16.msra.mxu1 %v2867_v52  ;;  %v2564_v52 = vld [vmem:[%s796_s11] ss:$0 sm:$0xff] }
 0xefb   : > { %v2036_v46 = vadd.f32 %v2550_v41, %v2027_v42  ;;  %v2028_v48 = vadd.f32 %v2023_v45, %v3612_v5  ;;  %v2751_v49 = vpop.f32.mrb[39].mxu0  ;;  %2754 = vmatprep.subr.bf16.mxu1 %v3097_v34  ;;  %v2870_v5 = vld [vmem:[%s3397_s4 + $0x8] sm:$0xff]  }
 0xefc   : > { %2763 = vmatpush3.bf16.msra.mxu0 %v2870_v5 }
 0xefd   : > { %v2037_v50 = vadd.f32 %v2550_v41, %v2028_v48  ;;  %v2038_v51 = vadd.f32 %v2036_v46, %v3427_v36  ;;  %2764 = vmatprep.subr.bf16.mxu0 %v3097_v34 }
 0xefe   : > { %2755 = vmatpush3.bf16.msra.mxu1 %v2868_v3 }
 0xeff   : > { %v2042_v53 = vsel %vm882_vm2, %v2038_v51, 0.0  ;;  %v2039_v54 = vadd.f32 %v2037_v50, %v3429_v37 }
 0xf00   : > { %2043 = vadd.xlane.f32.xlu1 %v2042_v53  ;;  %2765 = vmatpush3.bf16.msra.mxu0 %v2871_v44 }
 0xf01   : > { %v2045_v55 = vsel %vm882_vm2, %v2039_v54, 0.0  ;;  %2766 = vmatprep.subr.bf16.mxu0 %v3097_v34  ;;  %v2557_v34 = vld [vmem:[%s790_s28] ss:$0 sm:$0xff] }
 0xf02   : > { %2046 = vadd.xlane.f32.xlu0 %v2045_v55 }
 0xf04   : > { %2767 = vmatpush3.bf16.msra.mxu0 %v2872_v20 }
 0xf8d   : > { %v2044_v57 = vpop.xlane.xlu1 %2043 }
 0xf8e   : > { %v2049_v58 = vmul.f32 0.03125, %v2044_v57 }
 0xf8f   : > { %v2047_v59 = vpop.xlane.xlu0 %2046 }
 0xf90   : > { %v2051_v60 = vsub.f32 %v2038_v51, %v2049_v58  ;;  %v2050_v61 = vmul.f32 0.03125, %v2047_v59 }
 0xf92   : > { %v2052_v62 = vsub.f32 %v2039_v54, %v2050_v61  ;;  %v2053_v0 = vmul.f32 %v2051_v60, %v2051_v60 }
 0xf94   : > { %v2055_v36 = vsel %vm882_vm2, %v2053_v0, 0.0  ;;  %v2054_v1 = vmul.f32 %v2052_v62, %v2052_v62 }
 0xf95   : > { %2056 = vadd.xlane.f32.xlu1 %v2055_v36  ;;  %v2563_v36 = vld [vmem:[%s793_s19] ss:$0 sm:$0xff] }
 0xf96   : > { %v2058_v37 = vsel %vm882_vm2, %v2054_v1, 0.0 }
 0xf97   : > { %2059 = vadd.xlane.f32.xlu0 %v2058_v37 }
0x1022   : > { %v2057_v6 = vpop.xlane.xlu1 %2056 }
0x1023   : > { %v2061_v7 = vmul.f32 0.03125, %v2057_v6 }
0x1024   : > { %v2060_v8 = vpop.xlane.xlu0 %2059 }
0x1025   : > { %v2063_v9 = vadd.f32 1e-06, %v2061_v7  ;;  %v2062_v10 = vmul.f32 0.03125, %v2060_v8 }
0x1027   : > { %2905 = vrsqrt.f32 %v2063_v9  ;;  %v2064_v11 = vadd.f32 1e-06, %v2062_v10 }
0x1029   : > { %2907 = vrsqrt.f32 %v2064_v11 }
0x1031   : > { %v2906_v12 = vpop.eup %2905 }
0x1032   : > { %v2067_v63 = vmul.f32 %v2906_v12, %v2051_v60 }
0x1033   : > { %v2908_v14 = vpop.eup %2907 }
0x1034   : > { %v2075_v2 = vmul.f32 %v2551_v13, %v2067_v63  ;;  %v2068_v15 = vmul.f32 %v2908_v14, %v2052_v62 }
0x1036   : > { %v2076_v17 = vmul.f32 %v2551_v13, %v2068_v15  ;;  %v2083_v18 = vadd.f32 %v2552_v16, %v2075_v2 }
0x1038   : > { %v2084_v19 = vadd.f32 %v2552_v16, %v2076_v17 }
0x103a   : > { %v2085_v56 = vpack.c.bf16 %v2084_v19, %v2083_v18 }
0x103c   : > { %2757 = vmatmul.mubr.msk.bf16.vlgmr.msra.gmra.mrb[44].mxu1 %vm882_vm2, %v2085_v56 }
0x110f   : > { %v2146_v22 = vpop.f32.mrb[44].mxu1 }
0x1110   : > { %v2147_v23 = vadd.f32 %v2553_v21, %v2146_v22  ;;  %v2758_v24 = vpop.f32.mrb[45].mxu1 }
0x1111   : > { %v2149_v25 = vpop.f32.mrb[46].mxu1 }
0x1112   : > { %v2150_v26 = vadd.f32 %v2553_v21, %v2149_v25  ;;  %v2759_v27 = vpop.f32.mrb[47].mxu1  ;;  %v2153_v28 = vmax.f32 %v2147_v23, 0.0 }
0x1114   : > { %v2154_v47 = vmax.f32 %v2150_v26, 0.0 }
0x1116   : > { %v2155_v29 = vpack.c.bf16 %v2154_v47, %v2153_v28 }
0x1118   : > { %2769 = vmatmul.mubr.msk.bf16.vlgmr.msra.gmra.mrb[40].mxu0 %vm2195_vm7, %v2155_v29 }
0x11eb   : > { %v2233_v30 = vpop.f32.mrb[40].mxu0 }
0x11ec   : > { %v2234_v31 = vadd.f32 %v2557_v34, %v2233_v30  ;;  %v2770_v32 = vpop.f32.mrb[41].mxu0 }
0x11ed   : > { %v2236_v33 = vpop.f32.mrb[42].mxu0 }
0x11ee   : > { %v2237_v35 = vadd.f32 %v2557_v34, %v2236_v33  ;;  %v2771_v38 = vpop.f32.mrb[43].mxu0  ;;  %v2240_v39 = vadd.f32 %v2234_v31, %v2083_v18 }
0x11f0   : > { %v2244_v40 = vsel %vm882_vm2, %v2240_v39, 0.0  ;;  %v2241_v41 = vadd.f32 %v2237_v35, %v2084_v19 }
0x11f1   : > { %2245 = vadd.xlane.f32.xlu1 %v2244_v40 }
0x11f2   : > { %v2247_v42 = vsel %vm882_vm2, %v2241_v41, 0.0 }
0x11f3   : > { %2248 = vadd.xlane.f32.xlu0 %v2247_v42 }
0x127e   : > { %v2246_v43 = vpop.xlane.xlu1 %2245 }
0x127f   : > { %v2250_v45 = vmul.f32 0.03125, %v2246_v43 }
0x1280   : > { %v2249_v46 = vpop.xlane.xlu0 %2248 }
0x1281   : > { %v2252_v48 = vsub.f32 %v2240_v39, %v2250_v45  ;;  %v2251_v49 = vmul.f32 0.03125, %v2249_v46 }
0x1283   : > { %v2253_v50 = vsub.f32 %v2241_v41, %v2251_v49  ;;  %v2254_v51 = vmul.f32 %v2252_v48, %v2252_v48 }
0x1285   : > { %v2256_v53 = vsel %vm882_vm2, %v2254_v51, 0.0  ;;  %v2255_v54 = vmul.f32 %v2253_v50, %v2253_v50 }
0x1286   : > { %2257 = vadd.xlane.f32.xlu1 %v2256_v53 }
0x1287   : > { %v2259_v55 = vsel %vm882_vm2, %v2255_v54, 0.0 }
0x1288   : > { %2260 = vadd.xlane.f32.xlu0 %v2259_v55 }
0x1313   : > { %v2258_v57 = vpop.xlane.xlu1 %2257 }
0x1314   : > { %v2262_v58 = vmul.f32 0.03125, %v2258_v57 }
0x1315   : > { %v2261_v59 = vpop.xlane.xlu0 %2260 }
0x1316   : > { %v2264_v60 = vadd.f32 1e-06, %v2262_v58  ;;  %v2263_v61 = vmul.f32 0.03125, %v2261_v59 }
0x1318   : > { %2909 = vrsqrt.f32 %v2264_v60  ;;  %v2265_v62 = vadd.f32 1e-06, %v2263_v61 }
0x131a   : > { %2911 = vrsqrt.f32 %v2265_v62 }
0x1322   : > { %v2910_v0 = vpop.eup %2909 }
0x1323   : > { %v2268_v1 = vmul.f32 %v2910_v0, %v2252_v48 }
0x1324   : > { %v2912_v37 = vpop.eup %2911 }
0x1325   : > { %v2276_v3 = vmul.f32 %v2563_v36, %v2268_v1  ;;  %v2269_v4 = vmul.f32 %v2912_v37, %v2253_v50 }
0x1327   : > { %v2277_v5 = vmul.f32 %v2563_v36, %v2269_v4  ;;  %v2284_v6 = vadd.f32 %v2564_v52, %v2276_v3 }
0x1329   : > { %v2285_v7 = vadd.f32 %v2564_v52, %v2277_v5  ;;  %2286 = vst.msk [vmem:[#allocation10] sm:$0xff] %vm882_vm2, %v2284_v6 }
0x132b   : > { %2287 = vst.msk [vmem:[#allocation10 + $0x8] sm:$0xff] %vm882_vm2, %v2285_v7 }
0x132c   : > { %3038 = shalt.err (!%p3035_p1)
}
0x132d   : > { %s3809_s14 = sld [smem:[#allocation31_spill]] }
0x1333   : > { %s3039_s5 = scalar_lea.hbm %s3809_s14, 256 }
0x1334   : > { %p3040_p4 = scmp.ne.s32.totalorder %s3809_s14, %s3039_s5  ;;  %p3045_p8 = scmp.lt.u32.totalorder %s3039_s5, %s3809_s14 }
0x1336   : > { %p3041_p7 = pnand %p3040_p4, %p3695_p6 }
0x1338   : > { %p3042_p2 = pneg %p3041_p7 }
0x133a   : > { %p3047_p5 = pnand %p3045_p8, %p3042_p2 }
0x133c   : > { %3050 = shalt.err (!%p3047_p5)
}
0x133d   : > { %s3111_s22 = smov 128   ;;  %s3112_s21 = smov 8  }
0x133e   : > { %2789 = dma.vmem_to_hbm [thread:$0]  (%p3695_p6), %s2298_s12, 256, %s3809_s14, [#allocation4], %s3111_s22, %s3111_s22, %s3112_s21  }
0x133f   : > { %3076 = dma.done.wait (%p3695_p6), [#allocation4], 256  }
0x1340   : > { %3078 = vsyncadd (%p3695_p6), [#allocation4], 4294967040 }
0x1341 PF: > { %s3810_s27 = sld [smem:[#allocation16_spill]]  ;;  %s3811_s24 = sld [smem:[#allocation15_spill]] }
0x1342   : > { %s3812_s25 = sld [smem:[#allocation17_spill]] }
0x1347   : > { %s31_s26 = sadd.s32 1, %s3810_s27  }
0x1348   : > { %p28_p3 = scmp.ge.s32.totalorder %s31_s26, 4  }
0x134a   :  { %30 = sbr.rel (!%p28_p3) target bundleno = 20 (0x14), region = 172 }
0x1351   :  { %2313 = vsyncpa [#allocation3], 1 }
0x1352   :  { %2315 = vsyncpa [#allocation3 + $0x1], 1 }
0x1353   :  { %2316 = vsyncpa [#allocation6], 1 }
0x1354   :  { %2317 = vsyncpa [#allocation9], 1 }
0x1355   :  { %2318 = vsyncpa [#allocation4], 1 }
0x1356   :  { %2320 = vsyncpa [#allocation4 + $0x1], 1 }

</bundles_post_ra>
